<compile_context>
chip_gen: v7x
topology: tpu7x:2x2x1
jax: 0.10.0
libtpu: 0.0.40
codegen_flags: <defaults>
</compile_context>

<pallas_src>
import jax
import jax.numpy as jnp
from jax import lax
from jax.experimental import pallas as pl
from jax.experimental.pallas import tpu as pltpu

# Small, module-consistent shapes.
B = 2                 # batch
S = 16                # seq_len
E = 32                # embed_dim
H = 4                 # num_heads
DH = E // H           # head_dim = 8
BS = B * S            # flattened batch*seq rows = 32
E4 = E // 4           # neuromod hidden = 8
FUSED_COLS = 3 * E + E4   # 104 = Wq|Wk|Wv|W1 columns
LOCAL_CONTEXT = 8
HALF = LOCAL_CONTEXT // 2
SCALE = DH ** -0.5
LOG2_S = 4            # S == 16  (powers of two → shifts/ands, no int div)
LOG2_DH = 3           # DH == 8
LOG2_BS = 5           # BS == 32
NEG = -1e30           # additive mask value (avoids exp(-inf - -inf) NaN risk)


def _bio_attn_kernel(x_ref, w_in_ref, w_out_ref, scal_ref, out_ref, attnw_ref):
    """Single invocation: whole forward pass for all batches and heads."""
    x = x_ref[...]                         # [BS, E]
    w_in = w_in_ref[...]                   # [E+1, 104]   rows: Wq|Wk|Wv|W1 ; bias row
    w_out = w_out_ref[...]                 # [E+E4+2, E]  rows: Wo ; W2 ; bo ; b2

    wf = w_in[:E, :]                       # [E, 104]
    bf = w_in[E:E + 1, :]                  # [1, 104]
    wo = w_out[:E, :]                      # [E, E]
    w2 = w_out[E:E + E4, :]                # [E4, E]
    bo = w_out[E + E4:E + E4 + 1, :]       # [1, E]
    b2 = w_out[E + E4 + 1:E + E4 + 2, :]   # [1, E]

    # --- ONE MXU push: q | k | v | neuromod-hidden projections. ---
    fused = jnp.dot(x, wf, preferred_element_type=jnp.float32) + bf   # [BS, 104]
    q = fused[:, 0:E]
    k = fused[:, E:2 * E]
    v = fused[:, 2 * E:3 * E]
    h1 = jnp.maximum(fused[:, 3 * E:3 * E + E4], 0.0)                 # [BS, E4]

    # --- Constants, built ONCE (no per-head iota/select chains). ---
    # Dense kv-axis layout: col = head*BS + kv_batch*S + kv_pos  → [32, 128].
    row = lax.broadcasted_iota(jnp.int32, (BS, H * BS), 0)            # b*S + i
    col = lax.broadcasted_iota(jnp.int32, (BS, H * BS), 1)
    kv = jnp.bitwise_and(col, BS - 1)                                 # b'*S + j
    same_batch = jnp.right_shift(row, LOG2_S) == jnp.right_shift(kv, LOG2_S)
    diff = jnp.bitwise_and(kv, S - 1) - jnp.bitwise_and(row, S - 1)   # j - i
    valid = same_batch & (diff >= -HALF) & (diff <= HALF)
    bias = jnp.where(valid, jnp.float32(0.0), jnp.float32(NEG))       # [BS, H*BS]

    # Head-lane mask for the replicated K/V operands: [H*BS, E].
    rep_row = lax.broadcasted_iota(jnp.int32, (H * BS, E), 0)
    lane = lax.broadcasted_iota(jnp.int32, (H * BS, E), 1)
    head_mask = (jnp.right_shift(rep_row, LOG2_BS)
                 == jnp.right_shift(lane, LOG2_DH)).astype(jnp.float32)

    # --- ONE lane-dense score push for ALL heads & batches. ---
    # K_rep row (h*BS + t) = k[t, :] zeroed outside head h's 8 lanes, so the
    # full-E contraction yields exactly head h's dot product in column h*BS+t.
    k_rep = jnp.concatenate([k] * H, axis=0) * head_mask              # [H*BS, E]
    v_rep = jnp.concatenate([v] * H, axis=0) * head_mask              # [H*BS, E]
    s = lax.dot_general(q, k_rep, (((1,), (1,)), ((), ())),
                        preferred_element_type=jnp.float32)           # [BS, H*BS]
    s = s * SCALE + bias                                              # fused mask

    # --- Lane-dense softmax on the full [32,128] tile. ---
    # A global per-row max is a per-row constant → per-head softmax unchanged.
    mx = jnp.max(s, axis=-1, keepdims=True)                           # [BS, 1]
    ex = jnp.exp(s - mx)                                              # [BS, H*BS]

    # Per-head denominators via ONE block-diagonal-ones MXU push (per-lane denom).
    dr = lax.broadcasted_iota(jnp.int32, (H * BS, H * BS), 0)
    dc = lax.broadcasted_iota(jnp.int32, (H * BS, H * BS), 1)
    blockdiag = (jnp.right_shift(dr, LOG2_BS)
                 == jnp.right_shift(dc, LOG2_BS)).astype(jnp.float32)  # [128,128]
    denom = jnp.dot(ex, blockdiag, preferred_element_type=jnp.float32)
    p = ex * pl.reciprocal(denom, approx=False)                        # [BS, H*BS]

    # need_weights=True: one dense, unmasked [32,128] store; nothing held live.
    attnw_ref[...] = p
    # dropout(p=0.1) on the weights is identity in eval mode.

    # --- ONE PV push for ALL heads; each head lands on its own 8 output lanes.
    attn = jnp.dot(p, v_rep, preferred_element_type=jnp.float32)       # [BS, E]

    # --- Neuromodulation: Linear -> ReLU -> Linear, scaled by NT mean. ---
    mod = jnp.dot(h1, w2, preferred_element_type=jnp.float32) + b2     # [BS, E]
    nt_mean = (scal_ref[0] + scal_ref[1] + scal_ref[2] + scal_ref[3]) * 0.25
    attn = (attn * scal_ref[4] + scal_ref[5]) * (1.0 + mod * nt_mean)

    out_ref[...] = jnp.dot(attn, wo, preferred_element_type=jnp.float32) + bo


def pack_params(params):
    """One-time weight-blob packing (done at init time, NOT per forward call)."""
    wq, bq, wk, bk, wv, bv, wo, bo, w1, b1, w2, b2, scal = params
    w_in = jnp.concatenate(
        [jnp.concatenate([wq, wk, wv, w1], axis=1),     # [E, 104]
         jnp.concatenate([bq, bk, bv, b1], axis=1)],    # [1, 104]
        axis=0)                                         # [E+1, 104]
    w_out = jnp.concatenate([wo, w2, bo, b2], axis=0)   # [E+E4+2, E]
    return w_in, w_out, scal


@jax.jit
def local_biological_attention(x, w_in, w_out, scal):
    x_flat = x.reshape(BS, E)

    out_flat, attnw_dense = pl.pallas_call(
        _bio_attn_kernel,
        in_specs=[
            pl.BlockSpec(memory_space=pltpu.MemorySpace.VMEM),   # x
            pl.BlockSpec(memory_space=pltpu.MemorySpace.VMEM),   # fused in-proj blob
            pl.BlockSpec(memory_space=pltpu.MemorySpace.VMEM),   # out-proj/neuromod blob
            pl.BlockSpec(memory_space=pltpu.MemorySpace.SMEM),   # scalar params
        ],
        out_specs=(
            pl.BlockSpec(memory_space=pltpu.MemorySpace.VMEM),
            pl.BlockSpec(memory_space=pltpu.MemorySpace.VMEM),
        ),
        out_shape=(
            jax.ShapeDtypeStruct((BS, E), jnp.float32),          # output rows
            jax.ShapeDtypeStruct((BS, H * BS), jnp.float32),     # lane-dense weights
        ),
    )(x_flat, w_in, w_out, scal)

    output = out_flat.reshape(B, S, E)
    # Unpack lane-dense weights: dense[b*S+i, h*B*S + b'*S + j]; keep b' == b.
    w5 = attnw_dense.reshape(B, S, H, B, S)
    attn_w = jnp.stack([w5[b, :, :, b, :] for b in range(B)], axis=0)  # [B,S,H,S]
    attn_w = attn_w.transpose(0, 2, 1, 3)                              # [B,H,S,S]
    return output, attn_w


def init_params(key):
    """Deterministic synthetic parameters (PyTorch Linear-style uniform init)."""
    keys = jax.random.split(key, 6)

    def linear(k, fan_in, w_shape, b_shape):
        bound = 1.0 / jnp.sqrt(jnp.float32(fan_in))
        kw, kb = jax.random.split(k)
        w = jax.random.uniform(kw, w_shape, jnp.float32, -bound, bound)
        b = jax.random.uniform(kb, b_shape, jnp.float32, -bound, bound)
        return w, b

    # Weights stored pre-transposed as [in, out] so the kernel does x @ W + b.
    wq, bq = linear(keys[0], E, (E, E), (1, E))
    wk, bk = linear(keys[1], E, (E, E), (1, E))
    wv, bv = linear(keys[2], E, (E, E), (1, E))
    wo, bo = linear(keys[3], E, (E, E), (1, E))
    w1, b1 = linear(keys[4], E, (E, E4), (1, E4))
    w2, b2 = linear(keys[5], E4, (E4, E), (1, E))
    # [dopamine, serotonin, norepinephrine, acetylcholine, attention_scale, attention_bias]
    scal = jnp.array([1.0, 1.0, 1.0, 1.0, 1.0, 0.0], dtype=jnp.float32)
    return (wq, bq, wk, bk, wv, bv, wo, bo, w1, b1, w2, b2, scal)


def reference(x, params):
    """Pure-JAX mirror of the PyTorch forward (for verification)."""
    wq, bq, wk, bk, wv, bv, wo, bo, w1, b1, w2, b2, scal = params
    q = x @ wq + bq[0]
    k = x @ wk + bk[0]
    v = x @ wv + bv[0]
    split = lambda t: t.reshape(B, S, H, DH).transpose(0, 2, 1, 3)
    qh, kh, vh = split(q), split(k), split(v)
    scores = jnp.einsum('bhsd,bhtd->bhst', qh, kh) * SCALE
    i = jnp.arange(S)[:, None]
    j = jnp.arange(S)[None, :]
    mask = (j >= i - HALF) & (j <= i + HALF)
    scores = jnp.where(mask[None, None], scores, -jnp.inf)
    p = jax.nn.softmax(scores, axis=-1)
    attn = jnp.einsum('bhst,bhtd->bhsd', p, vh)
    mod = jnp.maximum(x.reshape(B * S, E) @ w1 + b1[0], 0.0) @ w2 + b2[0]
    neuromod = mod * ((scal[0] + scal[1] + scal[2] + scal[3]) / 4.0)
    neuromod = neuromod.reshape(B, S, H, DH).transpose(0, 2, 1, 3)
    attn = attn * scal[4] + scal[5]
    attn = attn * (1.0 + neuromod)
    attn = attn.transpose(0, 2, 1, 3).reshape(B, S, E)
    return attn @ wo + bo[0], p


if __name__ == "__main__":
    # Bit-stable f32 matmuls for both the kernel and the reference (cost is
    # negligible at these sizes; keeps the 1e-5 attention-weight tolerance safe).
    jax.config.update("jax_default_matmul_precision", "highest")

    key = jax.random.PRNGKey(0)
    kx, kp = jax.random.split(key)
    x = jax.random.normal(kx, (B, S, E), dtype=jnp.float32)
    params = init_params(kp)
    w_in, w_out, scal = pack_params(params)      # packed ONCE, outside the forward

    out, attn_w = local_biological_attention(x, w_in, w_out, scal)
    jax.block_until_ready((out, attn_w))

    ref_out, ref_w = reference(x, params)
    assert jnp.allclose(out, ref_out, atol=1e-4, rtol=1e-4), "output mismatch"
    assert jnp.allclose(attn_w, ref_w, atol=1e-5, rtol=1e-5), "attn weights mismatch"

    print("KERNEL_OK")
</pallas_src>

<mosaic_0001>
module attributes {stable_mosaic.version = 11 : i64} {
  func.func @_bio_attn_kernel(%arg0: memref<32x32xf32, #tpu.memory_space<vmem>>, %arg1: memref<33x104xf32, #tpu.memory_space<vmem>>, %arg2: memref<42x32xf32, #tpu.memory_space<vmem>>, %arg3: memref<6xf32, #tpu.memory_space<smem>>, %arg4: memref<32x32xf32, #tpu.memory_space<vmem>>, %arg5: memref<32x128xf32, #tpu.memory_space<vmem>>) attributes {dimension_semantics = [], scalar_prefetch = 0 : i64, scratch_operands = 0 : i64, tpu.core_type = #tpu.core_type<tc>} {
    %c0 = arith.constant 0 : index
    %c0_0 = arith.constant 0 : index
    %0 = vector.load %arg0[%c0, %c0_0] : memref<32x32xf32, #tpu.memory_space<vmem>>, vector<32x32xf32>
    %c0_1 = arith.constant 0 : index
    %c0_2 = arith.constant 0 : index
    %1 = vector.load %arg1[%c0_1, %c0_2] : memref<33x104xf32, #tpu.memory_space<vmem>>, vector<33x104xf32>
    %c0_3 = arith.constant 0 : index
    %c0_4 = arith.constant 0 : index
    %2 = vector.load %arg2[%c0_3, %c0_4] : memref<42x32xf32, #tpu.memory_space<vmem>>, vector<42x32xf32>
    %3 = vector.extract_strided_slice %1 {offsets = [0, 0], sizes = [32, 104], strides = [1, 1]} : vector<33x104xf32> to vector<32x104xf32>
    %4 = vector.extract_strided_slice %1 {offsets = [32, 0], sizes = [1, 104], strides = [1, 1]} : vector<33x104xf32> to vector<1x104xf32>
    %5 = vector.extract_strided_slice %2 {offsets = [0, 0], sizes = [32, 32], strides = [1, 1]} : vector<42x32xf32> to vector<32x32xf32>
    %6 = vector.extract_strided_slice %2 {offsets = [32, 0], sizes = [8, 32], strides = [1, 1]} : vector<42x32xf32> to vector<8x32xf32>
    %7 = vector.extract_strided_slice %2 {offsets = [40, 0], sizes = [1, 32], strides = [1, 1]} : vector<42x32xf32> to vector<1x32xf32>
    %8 = vector.extract_strided_slice %2 {offsets = [41, 0], sizes = [1, 32], strides = [1, 1]} : vector<42x32xf32> to vector<1x32xf32>
    %cst = arith.constant dense<0.000000e+00> : vector<32x104xf32>
    %9 = tpu.matmul %0, %3, %cst {dimension_numbers = #tpu.dot_dimension_numbers<[1], [0], [0], [1], [0, 0, 1, 1], [], []>, precision = #tpu.contract_precision<fp32>} : vector<32x32xf32>, vector<32x104xf32>, vector<32x104xf32> -> vector<32x104xf32>
    %10 = vector.broadcast %4 : vector<1x104xf32> to vector<32x104xf32>
    %11 = arith.addf %9, %10 : vector<32x104xf32>
    %12 = vector.extract_strided_slice %11 {offsets = [0, 0], sizes = [32, 32], strides = [1, 1]} : vector<32x104xf32> to vector<32x32xf32>
    %13 = vector.extract_strided_slice %11 {offsets = [0, 32], sizes = [32, 32], strides = [1, 1]} : vector<32x104xf32> to vector<32x32xf32>
    %14 = vector.extract_strided_slice %11 {offsets = [0, 64], sizes = [32, 32], strides = [1, 1]} : vector<32x104xf32> to vector<32x32xf32>
    %15 = vector.extract_strided_slice %11 {offsets = [0, 96], sizes = [32, 8], strides = [1, 1]} : vector<32x104xf32> to vector<32x8xf32>
    %cst_5 = arith.constant 0.000000e+00 : f32
    %16 = vector.broadcast %cst_5 : f32 to vector<32x8xf32>
    %17 = arith.maximumf %15, %16 : vector<32x8xf32>
    %18 = tpu.iota {dimensions = array<i32: 0>} : vector<32x128xi32>
    %19 = tpu.iota {dimensions = array<i32: 1>} : vector<32x128xi32>
    %c31_i32 = arith.constant 31 : i32
    %20 = vector.broadcast %c31_i32 : i32 to vector<32x128xi32>
    %21 = arith.andi %19, %20 : vector<32x128xi32>
    %c4_i32 = arith.constant 4 : i32
    %22 = vector.broadcast %c4_i32 : i32 to vector<32x128xi32>
    %23 = arith.shrsi %18, %22 : vector<32x128xi32>
    %c4_i32_6 = arith.constant 4 : i32
    %24 = vector.broadcast %c4_i32_6 : i32 to vector<32x128xi32>
    %25 = arith.shrsi %21, %24 : vector<32x128xi32>
    %26 = arith.cmpi eq, %23, %25 : vector<32x128xi32>
    %c15_i32 = arith.constant 15 : i32
    %27 = vector.broadcast %c15_i32 : i32 to vector<32x128xi32>
    %28 = arith.andi %21, %27 : vector<32x128xi32>
    %c15_i32_7 = arith.constant 15 : i32
    %29 = vector.broadcast %c15_i32_7 : i32 to vector<32x128xi32>
    %30 = arith.andi %18, %29 : vector<32x128xi32>
    %31 = arith.subi %28, %30 : vector<32x128xi32>
    %c-4_i32 = arith.constant -4 : i32
    %32 = vector.broadcast %c-4_i32 : i32 to vector<32x128xi32>
    %33 = arith.cmpi sge, %31, %32 : vector<32x128xi32>
    %34 = arith.andi %26, %33 : vector<32x128xi1>
    %c4_i32_8 = arith.constant 4 : i32
    %35 = vector.broadcast %c4_i32_8 : i32 to vector<32x128xi32>
    %36 = arith.cmpi sle, %31, %35 : vector<32x128xi32>
    %37 = arith.andi %34, %36 : vector<32x128xi1>
    %cst_9 = arith.constant 0.000000e+00 : f32
    %cst_10 = arith.constant -1.000000e+30 : f32
    %38 = vector.broadcast %cst_9 : f32 to vector<32x128xf32>
    %39 = vector.broadcast %cst_10 : f32 to vector<32x128xf32>
    %40 = arith.select %37, %38, %39 : vector<32x128xi1>, vector<32x128xf32>
    %41 = tpu.iota {dimensions = array<i32: 0>} : vector<128x32xi32>
    %42 = tpu.iota {dimensions = array<i32: 1>} : vector<128x32xi32>
    %c5_i32 = arith.constant 5 : i32
    %43 = vector.broadcast %c5_i32 : i32 to vector<128x32xi32>
    %44 = arith.shrsi %41, %43 : vector<128x32xi32>
    %c3_i32 = arith.constant 3 : i32
    %45 = vector.broadcast %c3_i32 : i32 to vector<128x32xi32>
    %46 = arith.shrsi %42, %45 : vector<128x32xi32>
    %47 = arith.cmpi eq, %44, %46 : vector<128x32xi32>
    %48 = arith.extui %47 : vector<128x32xi1> to vector<128x32xi32>
    %49 = arith.sitofp %48 : vector<128x32xi32> to vector<128x32xf32>
    %50 = tpu.concatenate %13, %13, %13, %13 in 0 : vector<32x32xf32>, vector<32x32xf32>, vector<32x32xf32>, vector<32x32xf32> -> vector<128x32xf32>
    %51 = arith.mulf %50, %49 : vector<128x32xf32>
    %52 = tpu.concatenate %14, %14, %14, %14 in 0 : vector<32x32xf32>, vector<32x32xf32>, vector<32x32xf32>, vector<32x32xf32> -> vector<128x32xf32>
    %53 = arith.mulf %52, %49 : vector<128x32xf32>
    %cst_11 = arith.constant dense<0.000000e+00> : vector<32x128xf32>
    %54 = tpu.matmul %12, %51, %cst_11 {dimension_numbers = #tpu.dot_dimension_numbers<[1], [1], [0], [0], [0, 0, 1, 0], [], []>, precision = #tpu.contract_precision<fp32>} : vector<32x32xf32>, vector<128x32xf32>, vector<32x128xf32> -> vector<32x128xf32>
    %cst_12 = arith.constant 0.353553385 : f32
    %55 = vector.broadcast %cst_12 : f32 to vector<32x128xf32>
    %56 = arith.mulf %54, %55 : vector<32x128xf32>
    %57 = arith.addf %56, %40 : vector<32x128xf32>
    %cst_13 = arith.constant dense<0xFF800000> : vector<32xf32>
    %58 = vector.multi_reduction <maximumf>, %57, %cst_13 [1] : vector<32x128xf32> to vector<32xf32>
    %59 = vector.shape_cast %58 : vector<32xf32> to vector<32x1xf32>
    %60 = vector.broadcast %59 : vector<32x1xf32> to vector<32x128xf32>
    %61 = arith.subf %57, %60 : vector<32x128xf32>
    %62 = math.exp %61 : vector<32x128xf32>
    %63 = tpu.iota {dimensions = array<i32: 0>} : vector<128x128xi32>
    %64 = tpu.iota {dimensions = array<i32: 1>} : vector<128x128xi32>
    %c5_i32_14 = arith.constant 5 : i32
    %65 = vector.broadcast %c5_i32_14 : i32 to vector<128x128xi32>
    %66 = arith.shrsi %63, %65 : vector<128x128xi32>
    %c5_i32_15 = arith.constant 5 : i32
    %67 = vector.broadcast %c5_i32_15 : i32 to vector<128x128xi32>
    %68 = arith.shrsi %64, %67 : vector<128x128xi32>
    %69 = arith.cmpi eq, %66, %68 : vector<128x128xi32>
    %70 = arith.extui %69 : vector<128x128xi1> to vector<128x128xi32>
    %71 = arith.sitofp %70 : vector<128x128xi32> to vector<128x128xf32>
    %cst_16 = arith.constant dense<0.000000e+00> : vector<32x128xf32>
    %72 = tpu.matmul %62, %71, %cst_16 {dimension_numbers = #tpu.dot_dimension_numbers<[1], [0], [0], [1], [0, 0, 1, 1], [], []>, precision = #tpu.contract_precision<fp32>} : vector<32x128xf32>, vector<128x128xf32>, vector<32x128xf32> -> vector<32x128xf32>
    %73 = tpu.reciprocal %72 : vector<32x128xf32> -> vector<32x128xf32>
    %74 = arith.mulf %62, %73 : vector<32x128xf32>
    %c0_17 = arith.constant 0 : index
    %c0_18 = arith.constant 0 : index
    %75 = vector.load %arg5[%c0_17, %c0_18] : memref<32x128xf32, #tpu.memory_space<vmem>>, vector<32x128xf32>
    tpu.vector_store %arg5[%c0_17, %c0_18], %74 {strides = array<i32>} : memref<32x128xf32, #tpu.memory_space<vmem>>, vector<32x128xf32>,
    %cst_19 = arith.constant dense<0.000000e+00> : vector<32x32xf32>
    %76 = tpu.matmul %74, %53, %cst_19 {dimension_numbers = #tpu.dot_dimension_numbers<[1], [0], [0], [1], [0, 0, 1, 1], [], []>, precision = #tpu.contract_precision<fp32>} : vector<32x128xf32>, vector<128x32xf32>, vector<32x32xf32> -> vector<32x32xf32>
    %cst_20 = arith.constant dense<0.000000e+00> : vector<32x32xf32>
    %77 = tpu.matmul %17, %6, %cst_20 {dimension_numbers = #tpu.dot_dimension_numbers<[1], [0], [0], [1], [0, 0, 1, 1], [], []>, precision = #tpu.contract_precision<fp32>} : vector<32x8xf32>, vector<8x32xf32>, vector<32x32xf32> -> vector<32x32xf32>
    %78 = vector.broadcast %8 : vector<1x32xf32> to vector<32x32xf32>
    %79 = arith.addf %77, %78 : vector<32x32xf32>
    %c0_21 = arith.constant 0 : index
    %80 = memref.load %arg3[%c0_21] : memref<6xf32, #tpu.memory_space<smem>>
    %c1 = arith.constant 1 : index
    %81 = memref.load %arg3[%c1] : memref<6xf32, #tpu.memory_space<smem>>
    %82 = arith.addf %80, %81 : f32
    %c2 = arith.constant 2 : index
    %83 = memref.load %arg3[%c2] : memref<6xf32, #tpu.memory_space<smem>>
    %84 = arith.addf %82, %83 : f32
    %c3 = arith.constant 3 : index
    %85 = memref.load %arg3[%c3] : memref<6xf32, #tpu.memory_space<smem>>
    %86 = arith.addf %84, %85 : f32
    %cst_22 = arith.constant 2.500000e-01 : f32
    %87 = arith.mulf %86, %cst_22 : f32
    %c4 = arith.constant 4 : index
    %88 = memref.load %arg3[%c4] : memref<6xf32, #tpu.memory_space<smem>>
    %89 = vector.broadcast %88 : f32 to vector<32x32xf32>
    %90 = arith.mulf %76, %89 : vector<32x32xf32>
    %c5 = arith.constant 5 : index
    %91 = memref.load %arg3[%c5] : memref<6xf32, #tpu.memory_space<smem>>
    %92 = vector.broadcast %91 : f32 to vector<32x32xf32>
    %93 = arith.addf %90, %92 : vector<32x32xf32>
    %94 = vector.broadcast %87 : f32 to vector<32x32xf32>
    %95 = arith.mulf %79, %94 : vector<32x32xf32>
    %cst_23 = arith.constant 1.000000e+00 : f32
    %96 = vector.broadcast %cst_23 : f32 to vector<32x32xf32>
    %97 = arith.addf %96, %95 : vector<32x32xf32>
    %98 = arith.mulf %93, %97 : vector<32x32xf32>
    %cst_24 = arith.constant dense<0.000000e+00> : vector<32x32xf32>
    %99 = tpu.matmul %98, %5, %cst_24 {dimension_numbers = #tpu.dot_dimension_numbers<[1], [0], [0], [1], [0, 0, 1, 1], [], []>, precision = #tpu.contract_precision<fp32>} : vector<32x32xf32>, vector<32x32xf32>, vector<32x32xf32> -> vector<32x32xf32>
    %100 = vector.broadcast %7 : vector<1x32xf32> to vector<32x32xf32>
    %101 = arith.addf %99, %100 : vector<32x32xf32>
    %c0_25 = arith.constant 0 : index
    %c0_26 = arith.constant 0 : index
    %102 = vector.load %arg4[%c0_25, %c0_26] : memref<32x32xf32, #tpu.memory_space<vmem>>, vector<32x32xf32>
    tpu.vector_store %arg4[%c0_25, %c0_26], %101 {strides = array<i32>} : memref<32x32xf32, #tpu.memory_space<vmem>>, vector<32x32xf32>,
    return
  }
}

</mosaic_0001>

<bundles_post_ra>
// kernel: local_biological_attention.1
= control target key start
LH: loop header
LB: loop body
LE: loop exit
PB: predicated region body
PF: predicated region fallthrough
CT: control target
= control target key end

     0   :  { %11 = vsyncpa [#allocation4], 0  ;;  %s9123_s0 = inlined_call_operand.vmem [shape: f32[32,32], index: 0, kind: input, shape index: {}]   ;;  %s9124_s1 = inlined_call_operand.vmem [shape: f32[33,104], index: 1, kind: input, shape index: {}]   ;;  %s9125_s2 = inlined_call_operand.vmem [shape: f32[42,32], index: 2, kind: input, shape index: {}]   ;;  %s9126_s3 = inlined_call_operand.vmem [shape: f32[6], index: 3, kind: input, shape index: {}]   ;;  %s9127_s4 = inlined_call_operand.hbm [shape: f32[32,32], index: 4, kind: output, shape index: {0}]   ;;  %s9128_s5 = inlined_call_operand.vmem [shape: f32[32,128], index: 5, kind: output, shape index: {1}]  }
   0x1   :  { %12 = vsyncpa [#allocation3], 0  ;;  %s25_s20 = sshll.u32 %s9126_s3, 4  ;;  %s26_s20 = int_to_ptr.vmem [resolvable:$true] %s25_s20 }
   0x2   :  { %s7175_s21 = scalar_lea.vmem %s26_s20, 16  ;;  %p7180_p1 = scmp.lt.s32.totalorder %s26_s20, %s26_s20 }
   0x3   :  { %p7176_p0 = scmp.ne.s32.totalorder %s26_s20, %s7175_s21  ;;  %p7181_p2 = scmp.lt.s32.totalorder %s7175_s21, %s7175_s21 }
   0x5   :  { %p7182_p3 = por %p7181_p2, %p7180_p1 }
   0x7   :  { %p7183_p4 = pnand %p7182_p3, %p7176_p0 }
   0x9   :  { %7186 = shalt.err (!%p7183_p4)
}
   0xa   :  { %s7213_s22 = smov [#allocation2]  }
   0xb   :  { %28 = dma.vmem_to_smem %s26_s20, 16, %s7213_s22, [#allocation4]  }
   0xc   :  { %7209 = dma.done.wait [#allocation4], 16  }
   0xd   :  { %7210 = vsyncadd [#allocation4], 4294967280 }
   0xe   :  { %32 = sfence }
   0xf   :  { %v37_v0 = vld [vmem:[%s9124_s1] sm:$0xff]  ;;  %v38_v1 = vld [vmem:[%s9124_s1 + $0x8] sm:$0xff]  ;;  %v39_v2 = vld [vmem:[%s9124_s1 + $0x10] sm:$0xff]  ;;  %vm9181_vm0 = vcmask 261120   ;;  %v683_v3 = vlaneseq  ;;  %s7219_s15 = smov 64   ;;  %s4105_s7 = sld [smem:[#allocation2]] }
  0x10   :  { %v66_v4 = vand.u32 4294901760, %v37_v0  ;;  %v69_v5 = vand.u32 4294901760, %v38_v1  ;;  %v40_v6 = vld [vmem:[%s9124_s1 + $0x18] sm:$0xff]  ;;  %v72_v7 = vand.u32 4294901760, %v39_v2  ;;  %v33_v8 = vld [vmem:[%s9123_s0] sm:$0xff]  ;;  %v34_v9 = vld [vmem:[%s9123_s0 + $0x8] sm:$0xff] }
  0x11   :  { %v75_v10 = vand.u32 4294901760, %v40_v6  ;;  %v54_v11 = vsel %vm9181_vm0, %v33_v8, 0  ;;  %v57_v12 = vsel %vm9181_vm0, %v34_v9, 0  ;;  %v35_v13 = vld [vmem:[%s9123_s0 + $0x10] sm:$0xff]  ;;  %v36_v14 = vld [vmem:[%s9123_s0 + $0x18] sm:$0xff]  ;;  %v7282_v15 = vshrl.u32 %v683_v3, 7 }
  0x12   :  { %v7284_v16 = vpack.c.bf16 %v69_v5, %v66_v4  ;;  %v7286_v17 = vand.u32 4294901760, %v54_v11  ;;  %v7288_v18 = vand.u32 4294901760, %v57_v12  ;;  %v7290_v19 = vsub.f32 %v37_v0, %v66_v4  ;;  %s7215_s0 = smov 32   ;;  %s4874_s8 = sld [smem:[#allocation2 + $0x1]] }
  0x13   :  { %9221 = vst [vmem:[#allocation8_spill] sm:$0xff] %v7282_v15  ;;  %v7292_v20 = vpack.c.bf16 %v75_v10, %v72_v7  ;;  %v7294_v21 = vsub.f32 %v38_v1, %v69_v5  ;;  %v60_v22 = vsel %vm9181_vm0, %v35_v13, 0  ;;  %v63_v23 = vsel %vm9181_vm0, %v36_v14, 0  ;;  %s4875_s9 = sld [smem:[#allocation2 + $0x2]]  ;;  %s4876_s11 = sld [smem:[#allocation2 + $0x3]] }
  0x14   :  { %6266 = vmatprep.subr.bf16.mxu0 %v7284_v16  ;;  %v7300_v24 = vsub.f32 %v54_v11, %v7286_v17  ;;  %v7303_v25 = vsub.f32 %v57_v12, %v7288_v18  ;;  %v177_v26 = vand.u32 4294901760, %v7290_v19  ;;  %v7306_v27 = vand.u32 4294901760, %v60_v22 }
  0x15   :  { %6268 = vmatpush3.bf16.msra.mxu0 %v7284_v16  ;;  %v184_v28 = vand.u32 4294901760, %v7294_v21  ;;  %v7310_v29 = vand.u32 4294901760, %v63_v23  ;;  %v7312_v30 = vsub.f32 %v39_v2, %v72_v7  ;;  %v7314_v31 = vsub.f32 %v40_v6, %v75_v10 }
  0x16   :  { %6270 = vmatprep.subr.bf16.mxu0 %v7292_v20  ;;  %v136_v32 = vand.u32 4294901760, %v7300_v24  ;;  %v146_v33 = vand.u32 4294901760, %v7303_v25  ;;  %v178_v34 = vsub.f32 %v7290_v19, %v177_v26  ;;  %v7323_v35 = vsub.f32 %v60_v22, %v7306_v27 }
  0x17   :  { %v185_v36 = vsub.f32 %v7294_v21, %v184_v28  ;;  %v7329_v37 = vsub.f32 %v63_v23, %v7310_v29  ;;  %v191_v38 = vand.u32 4294901760, %v7312_v30  ;;  %v198_v39 = vand.u32 4294901760, %v7314_v31 }
  0x18   :  { %v137_v40 = vsub.f32 %v7300_v24, %v136_v32  ;;  %v147_v41 = vsub.f32 %v7303_v25, %v146_v33  ;;  %v179_v42 = vand.u32 4294901760, %v178_v34  ;;  %v156_v43 = vand.u32 4294901760, %v7323_v35  ;;  %s4107_s10 = sadd.f32 %s4874_s8, %s4105_s7 }
  0x19   :  { %6272 = vmatpush3.bf16.msra.mxu0 %v7292_v20  ;;  %v186_v44 = vand.u32 4294901760, %v185_v36  ;;  %v166_v45 = vand.u32 4294901760, %v7329_v37  ;;  %v192_v46 = vsub.f32 %v7312_v30, %v191_v38  ;;  %v199_v47 = vsub.f32 %v7314_v31, %v198_v39 }
  0x1a   :  { %v138_v48 = vand.u32 4294901760, %v137_v40  ;;  %v148_v49 = vand.u32 4294901760, %v147_v41  ;;  %v157_v50 = vsub.f32 %v7323_v35, %v156_v43  ;;  %v7355_v58 = vadd.s32 8, %v7282_v15  ;;  %s4109_s12 = sadd.f32 %s4875_s9, %s4107_s10 }
  0x1b   :  { %v6273_v51 = vpack.c.bf16 %v186_v44, %v179_v42  ;;  %v167_v52 = vsub.f32 %v7329_v37, %v166_v45  ;;  %v193_v53 = vand.u32 4294901760, %v192_v46  ;;  %v200_v54 = vand.u32 4294901760, %v199_v47 }
  0x1c   :  { %5373 = vmatprep.mubr.f32.mxu0 %v138_v48  ;;  %v158_v55 = vand.u32 4294901760, %v157_v50  ;;  %9222 = vst [vmem:[#allocation9_spill] sm:$0xff] %v7355_v58  ;;  %v7357_v59 = vand.u32 127, %v683_v3  ;;  %v6281_v60 = vpack.c.bf16 %v7294_v21, %v7290_v19  ;;  %v741_v61 = vshra.s32 %v7282_v15, 5 }
  0x1d   :  { %5374 = vmatmul.mubr.f32.vlgmr.msra.gmra.mrb[0].mxu0 %v148_v49  ;;  %6274 = vmatprep.subr.bf16.mxu0 %v6273_v51  ;;  %v168_v56 = vand.u32 4294901760, %v167_v52  ;;  %v6277_v57 = vpack.c.bf16 %v200_v54, %v193_v53  ;;  %v7363_v62 = vadd.s32 32, %v7282_v15  ;;  %v7366_v63 = vadd.s32 40, %v7282_v15 }
  0x1e   :  { %9223 = vst [vmem:[#allocation10_spill] sm:$0xff] %v7357_v59  ;;  %6276 = vmatpush3.bf16.msra.mxu0 %v6273_v51  ;;  %5376 = vmatprep.mubr.f32.mxu0 %v158_v55  ;;  %v742_v0 = vshra.s32 %v7355_v58, 5  ;;  %v7370_v1 = vshra.s32 %v7357_v59, 3  ;;  %v7373_v2 = vshra.s32 %v7357_v59, 5  ;;  %v7376_v3 = vadd.s32 16, %v7282_v15 }
  0x1f   :  { %6278 = vmatprep.subr.bf16.mxu0 %v6277_v57  ;;  %v9134_v4 = vshra.s32 %v7363_v62, 5  ;;  %v9133_v5 = vshra.s32 %v7366_v63, 5  ;;  %v7381_v6 = vadd.s32 24, %v7282_v15  ;;  %v9226_v7 = vmov 0 }
  0x20   :  { %9224 = vst [vmem:[#allocation11_spill] sm:$0xff] %v7376_v3  ;;  %vm758_vm1 = vcmp.eq.s32.totalorder %v741_v61, %v7370_v1  ;;  %vm759_vm2 = vcmp.eq.s32.totalorder %v742_v0, %v7370_v1  ;;  %vm7386_vm3 = vcmp.eq.s32.totalorder %v741_v61, %v7373_v2  ;;  %vm7391_vm4 = vcmp.eq.s32.totalorder %v742_v0, %v7373_v2 }
  0x21   :  { %9225 = vst [vmem:[#allocation12_spill] sm:$0xff] %v7381_v6  ;;  %5377 = vmatmul.mubr.f32.gmra.mrb[2].mxu0 %v168_v56  ;;  %v9227_v7 = vsel %vm7386_vm3, 4294967295, %v9226_v7  ;;  %v9229_v8 = vmov 0  ;;  %v9131_v9 = vmov 0.0   ;;  %v6285_v14 = vpack.c.bf16 %v7314_v31, %v7312_v30 }
  0x22   :  { %9228 = vst [vmem:[#allocation13_spill] sm:$0xff] %v9227_v7  ;;  %v9230_v8 = vsel %vm7391_vm4, 4294967295, %v9229_v8  ;;  %6280 = vmatpush3.bf16.msra.mxu0 %v6277_v57  ;;  %5387 = vmatprep.mubr.f32.mxu0 %v7286_v17  ;;  %v4794_v10 = vsel %vm758_vm1, 1.0, %v9131_v9  ;;  %v4795_v11 = vsel %vm759_vm2, 1.0, %v9131_v9  ;;  %v7401_v12 = vsel %vm7386_vm3, 1.0, %v9131_v9 }
  0x23   :  { %9231 = vst [vmem:[#allocation14_spill] sm:$0xff] %v9230_v8  ;;  %9232 = vst [vmem:[#allocation15_spill] sm:$0xff] %v7401_v12  ;;  %v7406_v13 = vsel %vm7391_vm4, 1.0, %v9131_v9  ;;  %6282 = vmatprep.subr.bf16.mxu0 %v6281_v60  ;;  %v7410_v22 = vpack.i.bf16 %v4795_v11, %v4794_v10  ;;  %v743_v23 = vshra.s32 %v7376_v3, 5  ;;  %vm762_vm5 = vcmp.eq.s32.totalorder %v9134_v4, %v7370_v1 }
  0x24   :  { %9233 = vst [vmem:[#allocation16_spill] sm:$0xff] %v7406_v13  ;;  %vm763_vm6 = vcmp.eq.s32.totalorder %v9133_v5, %v7370_v1  ;;  %v4798_v34 = vsel %vm762_vm5, 1.0, %v9131_v9  ;;  %v7425_v40 = vadd.s32 48, %v7282_v15  ;;  %v744_v42 = vshra.s32 %v7381_v6, 5 }
  0x25   :  { %9234 = vst [vmem:[#allocation17_spill] sm:$0xff] %v7410_v22  ;;  %5388 = vmatmul.mubr.f32.vlgmr.msra.gmra.mrb[0].mxu0 %v7288_v18  ;;  %7080 = vrot.lane.b32.xlu0 %v7410_v22, %s7215_s0  ;;  %v4799_v36 = vsel %vm763_vm6, 1.0, %v9131_v9  ;;  %vm760_vm7 = vcmp.eq.s32.totalorder %v743_v23, %v7370_v1  ;;  %vm7433_vm8 = vcmp.eq.s32.totalorder %v743_v23, %v7373_v2  ;;  %v9237_v44 = vmov 0 }
  0x26   :  { %9235 = vst [vmem:[#allocation18_spill] sm:$0xff] %v7425_v40  ;;  %6284 = vmatpush3.bf16.msra.mxu0 %v6281_v60  ;;  %5390 = vmatprep.mubr.f32.mxu0 %v7306_v27  ;;  %v7428_v41 = vpack.i.bf16 %v4799_v36, %v4798_v34  ;;  %v9238_v44 = vsel %vm7433_vm8, 4294967295, %v9237_v44  ;;  %v7438_v46 = vadd.s32 56, %v7282_v15  ;;  %vm761_vm9 = vcmp.eq.s32.totalorder %v744_v42, %v7370_v1 }
  0x27   :  { %6286 = vmatprep.subr.bf16.mxu0 %v6285_v14  ;;  %9239 = vst [vmem:[#allocation20_spill] sm:$0xff] %v9238_v44  ;;  %v4796_v47 = vsel %vm760_vm7, 1.0, %v9131_v9  ;;  %vm7443_vm10 = vcmp.eq.s32.totalorder %v744_v42, %v7373_v2  ;;  %v9241_v48 = vmov 0  ;;  %v7450_v49 = vsel %vm7433_vm8, 1.0, %v9131_v9 }
  0x28   :  { %9236 = vst [vmem:[#allocation19_spill] sm:$0xff] %v7428_v41  ;;  %9240 = vst [vmem:[#allocation21_spill] sm:$0xff] %v7438_v46  ;;  %v9242_v48 = vsel %vm7443_vm10, 4294967295, %v9241_v48  ;;  %7090 = vrot.lane.b32.xlu1 %v7428_v41, %s7215_s0  ;;  %v4797_v50 = vsel %vm761_vm9, 1.0, %v9131_v9  ;;  %v7459_v51 = vsel %vm7443_vm10, 1.0, %v9131_v9  ;;  %v9130_v52 = vshra.s32 %v7425_v40, 5 }
  0x29   :  { %9243 = vst [vmem:[#allocation22_spill] sm:$0xff] %v9242_v48  ;;  %9244 = vst [vmem:[#allocation23_spill] sm:$0xff] %v7450_v49  ;;  %5391 = vmatmul.mubr.f32.gmra.mrb[2].mxu0 %v7310_v29  ;;  %v9129_v53 = vshra.s32 %v7438_v46, 5  ;;  %v7464_v54 = vpack.i.bf16 %v4797_v50, %v4796_v47  ;;  %v733_v55 = vadd.s32 64, %v7282_v15  ;;  %v734_v56 = vadd.s32 72, %v7282_v15 }
  0x2a   :  { %9245 = vst [vmem:[#allocation24_spill] sm:$0xff] %v7459_v51  ;;  %6288 = vmatpush3.bf16.msra.mxu0 %v6285_v14  ;;  %5401 = vmatprep.mubr.f32.mxu0 %v7300_v24  ;;  %v735_v57 = vadd.s32 80, %v7282_v15  ;;  %vm764_vm11 = vcmp.eq.s32.totalorder %v9130_v52, %v7370_v1  ;;  %v6297_v60 = vpack.c.bf16 %v184_v28, %v177_v26  ;;  %v736_v26 = vadd.s32 88, %v7282_v15 }
  0x2b   :  { %9246 = vst [vmem:[#allocation25_spill] sm:$0xff] %v7464_v54  ;;  %6290 = vmatprep.subr.bf16.mxu0 %v7284_v16  ;;  %vm765_vm12 = vcmp.eq.s32.totalorder %v9129_v53, %v7370_v1  ;;  %v7484_v61 = vpack.c.bf16 %v198_v39, %v191_v38  ;;  %7085 = vrot.lane.b32.xlu0 %v7464_v54, %s7215_s0  ;;  %v4800_v0 = vsel %vm764_vm11, 1.0, %v9131_v9  ;;  %v749_v19 = vshra.s32 %v733_v55, 5 }
  0x2c   :  { %v4801_v10 = vsel %vm765_vm12, 1.0, %v9131_v9  ;;  %v750_v21 = vshra.s32 %v734_v56, 5  ;;  %v751_v28 = vshra.s32 %v735_v57, 5  ;;  %v737_v30 = vadd.s32 96, %v7282_v15 }
  0x2d   :  { %5402 = vmatmul.mubr.f32.vlgmr.msra.gmra.mrb[0].mxu0 %v7303_v25  ;;  %v7491_v11 = vpack.i.bf16 %v4801_v10, %v4800_v0  ;;  %v738_v31 = vadd.s32 104, %v7282_v15  ;;  %v739_v38 = vadd.s32 112, %v7282_v15  ;;  %vm766_vm13 = vcmp.eq.s32.totalorder %v749_v19, %v7370_v1 }
  0x2e   :  { %6292 = vmatpush3.bf16.msra.mxu0 %v7284_v16  ;;  %5404 = vmatprep.mubr.f32.mxu0 %v7323_v35  ;;  %vm767_vm14 = vcmp.eq.s32.totalorder %v750_v21, %v7370_v1  ;;  %vm7505_vm15 = vcmp.eq.s32.totalorder %v749_v19, %v7373_v2  ;;  %v9248_v39 = vmov 0  ;;  %v752_v14 = vshra.s32 %v736_v26, 5 }
  0x2f   :  { %9247 = vst [vmem:[#allocation26_spill] sm:$0xff] %v7491_v11  ;;  %6294 = vmatprep.subr.bf16.mxu0 %v7292_v20  ;;  %7095 = vrot.lane.b32.xlu1 %v7491_v11, %s7215_s0  ;;  %v9249_v39 = vsel %vm7505_vm15, 4294967295, %v9248_v39  ;;  %v4802_v23 = vsel %vm766_vm13, 1.0, %v9131_v9  ;;  %v4803_v34 = vsel %vm767_vm14, 1.0, %v9131_v9  ;;  %vm7512_vm1 = vcmp.eq.s32.totalorder %v750_v21, %v7373_v2 }
  0x30   :  { %9250 = vst [vmem:[#allocation27_spill] sm:$0xff] %v9249_v39  ;;  %v9251_v36 = vmov 0  ;;  %v7519_v42 = vsel %vm7505_vm15, 1.0, %v9131_v9  ;;  %v7525_v47 = vsel %vm7512_vm1, 1.0, %v9131_v9  ;;  %v7527_v50 = vpack.i.bf16 %v4803_v34, %v4802_v23 }
  0x31   :  { %v9252_v36 = vsel %vm7512_vm1, 4294967295, %v9251_v36  ;;  %9254 = vst [vmem:[#allocation29_spill] sm:$0xff] %v7519_v42  ;;  %5405 = vmatmul.mubr.f32.gmra.mrb[2].mxu0 %v7329_v37  ;;  %9255 = vst [vmem:[#allocation30_spill] sm:$0xff] %v7525_v47  ;;  %vm768_vm2 = vcmp.eq.s32.totalorder %v751_v28, %v7370_v1  ;;  %vm769_vm5 = vcmp.eq.s32.totalorder %v752_v14, %v7370_v1  ;;  %v9257_v57 = vmov 0 }
  0x32   :  { %9253 = vst [vmem:[#allocation28_spill] sm:$0xff] %v9252_v36  ;;  %9256 = vst [vmem:[#allocation31_spill] sm:$0xff] %v7527_v50  ;;  %6296 = vmatpush3.bf16.msra.mxu0 %v7292_v20  ;;  %5415 = vmatprep.mubr.f32.mxu0 %v136_v32  ;;  %v4804_v55 = vsel %vm768_vm2, 1.0, %v9131_v9  ;;  %v4805_v56 = vsel %vm769_vm5, 1.0, %v9131_v9  ;;  %vm7537_vm6 = vcmp.eq.s32.totalorder %v751_v28, %v7373_v2  ;;  %v9260_v0 = vmov 0 }
  0x33   :  { %v9258_v57 = vsel %vm7537_vm6, 4294967295, %v9257_v57  ;;  %vm7542_vm7 = vcmp.eq.s32.totalorder %v752_v14, %v7373_v2  ;;  %6298 = vmatprep.subr.bf16.mxu0 %v6297_v60  ;;  %7100 = vrot.lane.b32.xlu0 %v7527_v50, %s7215_s0  ;;  %v7551_v24 = vsel %vm7537_vm6, 1.0, %v9131_v9  ;;  %v7558_v10 = vpack.i.bf16 %v4805_v56, %v4804_v55 }
  0x34   :  { %9259 = vst [vmem:[#allocation32_spill] sm:$0xff] %v9258_v57  ;;  %v9261_v0 = vsel %vm7542_vm7, 4294967295, %v9260_v0  ;;  %9263 = vst [vmem:[#allocation34_spill] sm:$0xff] %v7551_v24  ;;  %v7556_v32 = vsel %vm7542_vm7, 1.0, %v9131_v9  ;;  %v753_v19 = vshra.s32 %v737_v30, 5  ;;  %v754_v21 = vshra.s32 %v738_v31, 5 }
  0x35   :  { %9262 = vst [vmem:[#allocation33_spill] sm:$0xff] %v9261_v0  ;;  %9264 = vst [vmem:[#allocation35_spill] sm:$0xff] %v7556_v32  ;;  %v740_v26 = vadd.s32 120, %v7282_v15  ;;  %v755_v28 = vshra.s32 %v739_v38, 5  ;;  %5416 = vmatmul.mubr.f32.vlgmr.msra.gmra.mrb[0].mxu0 %v146_v33  ;;  %7105 = vrot.lane.b32.xlu1 %v7558_v10, %s7215_s0  ;;  %v9266_v14 = vmov 0  ;;  %v9269_v25 = vmov 0 }
  0x36   :  { %9265 = vst [vmem:[#allocation36_spill] sm:$0xff] %v7558_v10  ;;  %vm770_vm9 = vcmp.eq.s32.totalorder %v753_v19, %v7370_v1  ;;  %vm7567_vm11 = vcmp.eq.s32.totalorder %v753_v19, %v7373_v2  ;;  %6300 = vmatpush3.bf16.msra.mxu0 %v6297_v60  ;;  %5418 = vmatprep.mubr.f32.mxu0 %v156_v43  ;;  %v9275_v23 = vmov 0  ;;  %v9278_v34 = vmov 0 }
  0x37   :  { %v9267_v14 = vsel %vm7567_vm11, 4294967295, %v9266_v14  ;;  %vm771_vm12 = vcmp.eq.s32.totalorder %v754_v21, %v7370_v1  ;;  %v4806_v30 = vsel %vm770_vm9, 1.0, %v9131_v9  ;;  %vm7576_vm13 = vcmp.eq.s32.totalorder %v754_v21, %v7373_v2  ;;  %6302 = vmatprep.subr.bf16.mxu0 %v7484_v61 }
  0x38   :  { %9268 = vst [vmem:[#allocation37_spill] sm:$0xff] %v9267_v14  ;;  %v9270_v25 = vsel %vm7576_vm13, 4294967295, %v9269_v25  ;;  %v7583_v33 = vsel %vm7567_vm11, 1.0, %v9131_v9  ;;  %v4807_v60 = vsel %vm771_vm12, 1.0, %v9131_v9  ;;  %v7590_v35 = vsel %vm7576_vm13, 1.0, %v9131_v9 }
  0x39   :  { %9271 = vst [vmem:[#allocation38_spill] sm:$0xff] %v9270_v25  ;;  %9272 = vst [vmem:[#allocation39_spill] sm:$0xff] %v7583_v33  ;;  %v756_v43 = vshra.s32 %v740_v26, 5  ;;  %vm772_vm14 = vcmp.eq.s32.totalorder %v755_v28, %v7370_v1  ;;  %v7593_v31 = vpack.i.bf16 %v4807_v60, %v4806_v30  ;;  %vm7597_vm2 = vcmp.eq.s32.totalorder %v755_v28, %v7373_v2 }
  0x3a   :  { %9273 = vst [vmem:[#allocation40_spill] sm:$0xff] %v7590_v35  ;;  %v4808_v38 = vsel %vm772_vm14, 1.0, %v9131_v9  ;;  %v9276_v23 = vsel %vm7597_vm2, 4294967295, %v9275_v23  ;;  %5419 = vmatmul.mubr.f32.gmra.mrb[2].mxu0 %v166_v45  ;;  %v7612_v55 = vsel %vm7597_vm2, 1.0, %v9131_v9  ;;  %vm8116_vm2 = vmpackc.low %vm7443_vm10, %vm7433_vm8 }
  0x3b   :  { %9274 = vst [vmem:[#allocation41_spill] sm:$0xff] %v7593_v31  ;;  %9277 = vst [vmem:[#allocation42_spill] sm:$0xff] %v9276_v23  ;;  %vm773_vm5 = vcmp.eq.s32.totalorder %v756_v43, %v7370_v1  ;;  %vm7605_vm9 = vcmp.eq.s32.totalorder %v756_v43, %v7373_v2  ;;  %6304 = vmatpush3.bf16.msra.mxu0 %v7484_v61  ;;  %5429 = vmatprep.mubr.f32.mxu0 %v7286_v17 }
  0x3c   :  { %v9279_v34 = vsel %vm7605_vm9, 4294967295, %v9278_v34  ;;  %9281 = vst [vmem:[#allocation44_spill] sm:$0xff] %v7612_v55  ;;  %v4809_v56 = vsel %vm773_vm5, 1.0, %v9131_v9  ;;  %v7620_v37 = vsel %vm7605_vm9, 1.0, %v9131_v9  ;;  %6306 = vmatprep.subr.bf16.mxu0 %v7284_v16  ;;  %7110 = vrot.lane.b32.xlu0 %v7593_v31, %s7215_s0  ;;  %vm8104_vm9 = vmpackc.low %vm7391_vm4, %vm7386_vm3 }
  0x3d   :  { %9280 = vst [vmem:[#allocation43_spill] sm:$0xff] %v9279_v34  ;;  %9282 = vst [vmem:[#allocation45_spill] sm:$0xff] %v7620_v37  ;;  %v7625_v45 = vpack.i.bf16 %v4809_v56, %v4808_v38 }
  0x3e   :  { %5430 = vmatmul.mubr.f32.vlgmr.msra.gmra.mrb[0].mxu0 %v7288_v18 }
  0x3f   :  { %9283 = vst [vmem:[#allocation46_spill] sm:$0xff] %v7625_v45  ;;  %7115 = vrot.lane.b32.xlu1 %v7625_v45, %s7215_s0  ;;  %6308 = vmatpush3.bf16.msra.mxu0 %v7284_v16  ;;  %v4793_v16 = vld [vmem:[%s9124_s1 + $0x20] ss:$0 sm:$0xff]  ;;  %s7216_s1 = smov 96  }
  0x40   :  { %5432 = vmatprep.mubr.f32.mxu0 %v7306_v27  ;;  %6310 = vmatprep.subr.bf16.mxu0 %v7292_v20 }
  0x42   :  { %5433 = vmatmul.mubr.f32.gmra.mrb[2].mxu0 %v7310_v29 }
  0x43   :  { %6312 = vmatpush3.bf16.msra.mxu0 %v7292_v20  ;;  %5443 = vmatprep.mubr.f32.mxu0 %v7286_v17 }
  0x46   :  { %5444 = vmatmul.mubr.f32.vlgmr.msra.gmra.mrb[0].mxu0 %v7288_v18 }
  0x47   :  { %5446 = vmatprep.mubr.f32.mxu0 %v7306_v27 }
  0x4a   :  { %5447 = vmatmul.mubr.f32.gmra.mrb[2].mxu0 %v7310_v29 }
  0x97   :  { %v7081_v1 = vpop.permute.xlu0 %7080 }
  0x98   :  { %v7083_v61 = vunpack.i.h.bf16 %v7081_v1  ;;  %v7082_v19 = vunpack.i.l.bf16 %v7081_v1 }
  0x9a   :  { %v7091_v27 = vpop.permute.xlu1 %7090 }
  0x9b   :  { %v7092_v53 = vunpack.i.l.bf16 %v7091_v27 }
  0x9d   :  { %v7086_v20 = vpop.permute.xlu0 %7085 }
  0x9e   :  { %v7088_v17 = vunpack.i.h.bf16 %v7086_v20  ;;  %v7087_v60 = vunpack.i.l.bf16 %v7086_v20 }
  0xa1   :  { %v7096_v52 = vpop.permute.xlu1 %7095 }
  0xa7   :  { %v7106_v5 = vpop.permute.xlu1 %7105 }
 0x119   :  { %v5445_v21 = vpop.f32.mrb[0].mxu0 }
 0x11a   :  { %v7642_v26 = vadd.f32 %v5445_v21, %v4793_v16  ;;  %v657_v28 = vpop.f32.mrb[1].mxu0 }
 0x11b   :  { %v7644_v30 = vadd.f32 %v4793_v16, %v657_v28 }
 0x11c   :  { %9284 = vst [vmem:[#allocation47_spill] sm:$0xff] %v7642_v26  ;;  %v871_v18 = vmul.f32 %v7083_v61, %v7642_v26  ;;  %v7093_v61 = vunpack.i.h.bf16 %v7091_v27 }
 0x11d   :  { %9285 = vst [vmem:[#allocation48_spill] sm:$0xff] %v7644_v30  ;;  %v5448_v29 = vpop.f32.mrb[2].mxu0  ;;  %v870_v43 = vmul.f32 %v7082_v19, %v7644_v30  ;;  %v999_v38 = vsel %vm9181_vm0, %v7644_v30, 0 }
 0x11e   :  { %v7650_v56 = vadd.f32 %v5448_v29, %v4793_v16  ;;  %968 = vrot.lane.b32.xlu1 %v871_v18, %s7216_s1  ;;  %v669_v1 = vpop.f32.mrb[3].mxu0  ;;  %v7653_v21 = vand.u32 4294901760, %v999_v38 }
 0x11f   :  { %v7655_v28 = vadd.f32 %v4793_v16, %v669_v1  ;;  %966 = vrot.lane.b32.xlu0 %v870_v43, %s7216_s1  ;;  %v7098_v16 = vunpack.i.h.bf16 %v7096_v52  ;;  %v875_v1 = vmul.f32 %v7093_v61, %v7642_v26  ;;  %v7097_v43 = vunpack.i.l.bf16 %v7096_v52 }
 0x120   :  { %9286 = vst [vmem:[#allocation49_spill] sm:$0xff] %v7650_v56  ;;  %v873_v20 = vmul.f32 %v7088_v17, %v7650_v56  ;;  %v7660_v19 = vsub.f32 %v999_v38, %v7653_v21  ;;  %v874_v38 = vmul.f32 %v7092_v53, %v7644_v30  ;;  %v7108_v52 = vunpack.i.h.bf16 %v7106_v5 }
 0x121   :  { %9287 = vst [vmem:[#allocation50_spill] sm:$0xff] %v7655_v28  ;;  %v872_v29 = vmul.f32 %v7087_v60, %v7655_v28  ;;  %v7101_v60 = vpop.permute.xlu0 %7100  ;;  %v876_v61 = vmul.f32 %v7097_v43, %v7655_v28 }
 0x122   :  { %972 = vrot.lane.b32.xlu1 %v873_v20, %s7216_s1  ;;  %v9135_v18 = vand.u32 4294901760, %v7660_v19  ;;  %v7103_v20 = vunpack.i.h.bf16 %v7101_v60  ;;  %v7102_v9 = vunpack.i.l.bf16 %v7101_v60 }
 0x123   :  { %970 = vrot.lane.b32.xlu0 %v872_v29, %s7216_s1  ;;  %v877_v29 = vmul.f32 %v7098_v16, %v7650_v56 }
 0x124   :  { %v1126_v17 = vsub.f32 %v7660_v19, %v9135_v18  ;;  %v879_v53 = vmul.f32 %v7103_v20, %v7642_v26  ;;  %v878_v4 = vmul.f32 %v7102_v9, %v7644_v30 }
 0x126   :  { %976 = vrot.lane.b32.xlu1 %v875_v1, %s7216_s1  ;;  %v1127_v27 = vand.u32 4294901760, %v1126_v17  ;;  %v7107_v1 = vunpack.i.l.bf16 %v7106_v5  ;;  %v7111_v17 = vpop.permute.xlu0 %7110 }
 0x127   :  { %974 = vrot.lane.b32.xlu0 %v874_v38, %s7216_s1  ;;  %v7113_v16 = vunpack.i.h.bf16 %v7111_v17  ;;  %v881_v38 = vmul.f32 %v7108_v52, %v7650_v56  ;;  %v7112_v43 = vunpack.i.l.bf16 %v7111_v17 }
 0x128   :  { %5481 = vmatprep.mubr.f32.mxu1 %v1127_v27  ;;  %v7116_v27 = vpop.permute.xlu1 %7115  ;;  %v880_v60 = vmul.f32 %v7107_v1, %v7655_v28 }
 0x129   :  { %v7118_v20 = vunpack.i.h.bf16 %v7116_v27  ;;  %v883_v5 = vmul.f32 %v7113_v16, %v7642_v26  ;;  %v882_v9 = vmul.f32 %v7112_v43, %v7644_v30 }
 0x12a   :  { %980 = vrot.lane.b32.xlu1 %v877_v29, %s7216_s1  ;;  %v7117_v29 = vunpack.i.l.bf16 %v7116_v27 }
 0x12b   :  { %978 = vrot.lane.b32.xlu0 %v876_v61, %s7216_s1 }
 0x12c   :  { %v884_v61 = vmul.f32 %v7117_v29, %v7655_v28 }
 0x12e   :  { %984 = vrot.lane.b32.xlu1 %v879_v53, %s7216_s1 }
 0x12f   :  { %982 = vrot.lane.b32.xlu0 %v878_v4, %s7216_s1  ;;  %v885_v4 = vmul.f32 %v7118_v20, %v7650_v56 }
 0x132   :  { %988 = vrot.lane.b32.xlu1 %v881_v38, %s7216_s1 }
 0x133   :  { %986 = vrot.lane.b32.xlu0 %v880_v60, %s7216_s1 }
 0x136   :  { %992 = vrot.lane.b32.xlu1 %v883_v5, %s7216_s1 }
 0x137   :  { %990 = vrot.lane.b32.xlu0 %v882_v9, %s7216_s1 }
 0x13a   :  { %996 = vrot.lane.b32.xlu1 %v885_v4, %s7216_s1 }
 0x13b   :  { %994 = vrot.lane.b32.xlu0 %v884_v61, %s7216_s1  ;;  %s4111_s1 = sadd.f32 %s4876_s11, %s4109_s12 }
 0x13d   :  { %s4112_s16 = smul.f32 0.25, %s4111_s1 }
 0x190   :  { %v969_v52 = vpop.permute.xlu1 %968 }
 0x191   :  { %v1012_v53 = vsel %vm9181_vm0, %v969_v52, 0  ;;  %v967_v1 = vpop.permute.xlu0 %966 }
 0x192   :  { %v1046_v17 = vand.u32 4294901760, %v1012_v53  ;;  %v1010_v16 = vsel %vm9181_vm0, %v967_v1, 0 }
 0x193   :  { %v1043_v38 = vand.u32 4294901760, %v1010_v16 }
 0x194   :  { %v7695_v43 = vsub.f32 %v1012_v53, %v1046_v17  ;;  %v973_v27 = vpop.permute.xlu1 %972 }
 0x195   :  { %v7697_v60 = vpack.c.bf16 %v1046_v17, %v1043_v38  ;;  %v7699_v20 = vsub.f32 %v1010_v16, %v1043_v38  ;;  %v1016_v5 = vsel %vm9181_vm0, %v973_v27, 0  ;;  %v971_v29 = vpop.permute.xlu0 %970 }
 0x196   :  { %v1052_v9 = vand.u32 4294901760, %v1016_v5  ;;  %v1014_v4 = vsel %vm9181_vm0, %v971_v29, 0 }
 0x197   :  { %v1049_v61 = vand.u32 4294901760, %v1014_v4  ;;  %6314 = vmatprep.subr.bf16.mxu1 %v7697_v60  ;;  %v7706_v52 = vpack.c.bf16 %v7695_v43, %v7699_v20 }
 0x198   :  { %v7710_v17 = vsub.f32 %v1016_v5, %v1052_v9  ;;  %v977_v16 = vpop.permute.xlu1 %976  ;;  %6316 = vmatpush3.bf16.xpose.msra.mxu1 %v7697_v60 }
 0x199   :  { %v7713_v38 = vpack.c.bf16 %v1052_v9, %v1049_v61  ;;  %v7715_v27 = vsub.f32 %v1014_v4, %v1049_v61  ;;  %v1020_v29 = vsel %vm9181_vm0, %v977_v16, 0  ;;  %v975_v18 = vpop.permute.xlu0 %974  ;;  %v9288_v61 = vand.u32 4294901760, %v7699_v20 }
 0x19a   :  { %v1058_v30 = vand.u32 4294901760, %v1020_v29  ;;  %v1018_v31 = vsel %vm9181_vm0, %v975_v18, 0  ;;  %v9289_v16 = vand.u32 4294901760, %v7695_v43 }
 0x19b   :  { %v1055_v34 = vand.u32 4294901760, %v1018_v31  ;;  %6318 = vmatprep.subr.bf16.mxu1 %v7713_v38  ;;  %v7722_v5 = vpack.c.bf16 %v7710_v17, %v7715_v27 }
 0x19c   :  { %v7726_v1 = vsub.f32 %v1020_v29, %v1058_v30  ;;  %v981_v4 = vpop.permute.xlu1 %980  ;;  %v7732_v23 = vpack.c.bf16 %v9289_v16, %v9288_v61 }
 0x19d   :  { %v7734_v18 = vsub.f32 %v1018_v31, %v1055_v34  ;;  %v1024_v50 = vsel %vm9181_vm0, %v981_v4, 0  ;;  %v979_v25 = vpop.permute.xlu0 %978  ;;  %v7739_v9 = vpack.c.bf16 %v1058_v30, %v1055_v34  ;;  %v9290_v4 = vand.u32 4294901760, %v7715_v27 }
 0x19e   :  { %v1064_v14 = vand.u32 4294901760, %v1024_v50  ;;  %v1022_v45 = vsel %vm9181_vm0, %v979_v25, 0  ;;  %v9291_v25 = vand.u32 4294901760, %v7710_v17 }
 0x19f   :  { %v1061_v29 = vand.u32 4294901760, %v1022_v45  ;;  %v7747_v31 = vpack.c.bf16 %v7726_v1, %v7734_v18 }
 0x1a0   :  { %v7742_v0 = vsub.f32 %v1024_v50, %v1064_v14  ;;  %v985_v57 = vpop.permute.xlu1 %984  ;;  %6320 = vmatpush3.bf16.xpose.msra.mxu1 %v7713_v38  ;;  %v7753_v61 = vpack.c.bf16 %v9291_v25, %v9290_v4  ;;  %v9293_v4 = vand.u32 4294901760, %v7726_v1 }
 0x1a1   :  { %v7755_v34 = vsub.f32 %v1022_v45, %v1061_v29  ;;  %v1028_v30 = vsel %vm9181_vm0, %v985_v57, 0  ;;  %6322 = vmatprep.subr.bf16.mxu1 %v7739_v9  ;;  %v983_v50 = vpop.permute.xlu0 %982  ;;  %v9292_v57 = vand.u32 4294901760, %v7734_v18  ;;  %v7778_v36 = vpack.c.bf16 %v1064_v14, %v1061_v29 }
 0x1a2   :  { %v1070_v16 = vand.u32 4294901760, %v1028_v30  ;;  %v1026_v53 = vsel %vm9181_vm0, %v983_v50, 0 }
 0x1a3   :  { %v1067_v10 = vand.u32 4294901760, %v1026_v53  ;;  %v7766_v45 = vpack.c.bf16 %v7742_v0, %v7755_v34  ;;  %v7772_v25 = vpack.c.bf16 %v9293_v4, %v9292_v57 }
 0x1a4   :  { %v7762_v39 = vsub.f32 %v1028_v30, %v1070_v16  ;;  %v989_v11 = vpop.permute.xlu1 %988 }
 0x1a5   :  { %v7774_v37 = vsub.f32 %v1026_v53, %v1067_v10  ;;  %v1032_v50 = vsel %vm9181_vm0, %v989_v11, 0  ;;  %v987_v54 = vpop.permute.xlu0 %986  ;;  %v9294_v11 = vand.u32 4294901760, %v7755_v34  ;;  %v7819_v58 = vpack.c.bf16 %v1070_v16, %v1067_v10 }
 0x1a6   :  { %v1076_v55 = vand.u32 4294901760, %v1032_v50  ;;  %v1030_v30 = vsel %vm9181_vm0, %v987_v54, 0  ;;  %v9295_v54 = vand.u32 4294901760, %v7742_v0 }
 0x1a7   :  { %v1073_v35 = vand.u32 4294901760, %v1030_v30  ;;  %v7787_v53 = vpack.c.bf16 %v7762_v39, %v7774_v37 }
 0x1a8   :  { %v7782_v22 = vsub.f32 %v1032_v50, %v1076_v55  ;;  %v993_v32 = vpop.permute.xlu1 %992  ;;  %6324 = vmatpush3.bf16.xpose.msra.mxu1 %v7739_v9  ;;  %v7793_v14 = vpack.c.bf16 %v9295_v54, %v9294_v11  ;;  %v9297_v11 = vand.u32 4294901760, %v7762_v39 }
 0x1a9   :  { %v7795_v29 = vsub.f32 %v1030_v30, %v1073_v35  ;;  %v1036_v57 = vsel %vm9181_vm0, %v993_v32, 0  ;;  %6326 = vmatprep.subr.bf16.mxu1 %v7778_v36  ;;  %v991_v4 = vpop.permute.xlu0 %990  ;;  %v9296_v32 = vand.u32 4294901760, %v7774_v37 }
 0x1aa   :  { %v1082_v50 = vand.u32 4294901760, %v1036_v57  ;;  %v1034_v41 = vsel %vm9181_vm0, %v991_v4, 0 }
 0x1ab   :  { %v1079_v24 = vand.u32 4294901760, %v1034_v41  ;;  %v7806_v30 = vpack.c.bf16 %v7782_v22, %v7795_v29  ;;  %v7812_v54 = vpack.c.bf16 %v9297_v11, %v9296_v32  ;;  %v9299_v32 = vand.u32 4294901760, %v7782_v22 }
 0x1ac   :  { %v7802_v42 = vsub.f32 %v1036_v57, %v1082_v50  ;;  %v997_v6 = vpop.permute.xlu1 %996 }
 0x1ad   :  { %v7814_v3 = vsub.f32 %v1034_v41, %v1079_v24  ;;  %v1040_v4 = vsel %vm9181_vm0, %v997_v6, 0  ;;  %v995_v33 = vpop.permute.xlu0 %994  ;;  %v9298_v6 = vand.u32 4294901760, %v7795_v29 }
 0x1ae   :  { %v9167_v47 = vand.u32 4294901760, %v7802_v42  ;;  %v1088_v57 = vand.u32 4294901760, %v1040_v4  ;;  %v1038_v15 = vsel %vm9181_vm0, %v995_v33, 0 }
 0x1af   :  { %v9166_v59 = vand.u32 4294901760, %v7814_v3  ;;  %v1085_v48 = vand.u32 4294901760, %v1038_v15  ;;  %v7827_v41 = vpack.c.bf16 %v7802_v42, %v7814_v3  ;;  %v7833_v11 = vpack.c.bf16 %v9299_v32, %v9298_v6 }
 0x1b0   :  { %v7822_v44 = vsub.f32 %v1040_v4, %v1088_v57  ;;  %6328 = vmatpush3.bf16.xpose.msra.mxu1 %v7778_v36  ;;  %v7856_v6 = vpack.c.bf16 %v1076_v55, %v1073_v35  ;;  %v7860_v32 = vpack.c.bf16 %v1082_v50, %v1079_v24  ;;  %v1008_v55 = vsel %vm9181_vm0, %v7650_v56, 0 }
 0x1b1   :  { %v7835_v33 = vsub.f32 %v1038_v15, %v1085_v48  ;;  %6330 = vmatprep.subr.bf16.mxu1 %v7819_v58  ;;  %v7843_v16 = vpack.c.bf16 %v9167_v47, %v9166_v59  ;;  %v1002_v59 = vsel %vm9181_vm0, %v7642_v26, 0  ;;  %v1005_v47 = vsel %vm9181_vm0, %v7655_v28, 0 }
 0x1b2   :  { %v9169_v10 = vand.u32 4294901760, %v7822_v44  ;;  %v7870_v35 = vand.u32 4294901760, %v1005_v47  ;;  %v9300_v24 = vand.u32 4294901760, %v7695_v43  ;;  %v7880_v51 = vpack.c.bf16 %v1088_v57, %v1085_v48 }
 0x1b3   :  { %v9168_v4 = vand.u32 4294901760, %v7835_v33  ;;  %v7848_v8 = vpack.c.bf16 %v7822_v44, %v7835_v33  ;;  %v7887_v26 = vand.u32 4294901760, %v1008_v55  ;;  %v9302_v57 = vand.u32 4294901760, %v7710_v17 }
 0x1b4   :  { %v1174_v50 = vsub.f32 %v7695_v43, %v9300_v24  ;;  %v7890_v56 = vsub.f32 %v1005_v47, %v7870_v35 }
 0x1b5   :  { %v7854_v15 = vpack.c.bf16 %v9169_v10, %v9168_v4  ;;  %v7868_v4 = vand.u32 4294901760, %v1002_v59  ;;  %v9301_v10 = vand.u32 4294901760, %v7699_v20 }
 0x1b6   :  { %v1175_v43 = vand.u32 4294901760, %v1174_v50  ;;  %v1145_v48 = vand.u32 4294901760, %v7890_v56 }
 0x1b7   :  { %v1167_v7 = vsub.f32 %v7699_v20, %v9301_v10  ;;  %v7885_v28 = vsub.f32 %v1002_v59, %v7868_v4  ;;  %v7894_v20 = vsub.f32 %v1008_v55, %v7887_v26  ;;  %v1188_v10 = vsub.f32 %v7710_v17, %v9302_v57 }
 0x1b8   :  { %6332 = vmatpush3.bf16.xpose.msra.mxu1 %v7819_v58  ;;  %v9303_v59 = vand.u32 4294901760, %v7715_v27  ;;  %v1146_v55 = vsub.f32 %v7890_v56, %v1145_v48 }
 0x1b9   :  { %6334 = vmatprep.subr.bf16.mxu1 %v7856_v6  ;;  %v1168_v49 = vand.u32 4294901760, %v1167_v7  ;;  %v9178_v24 = vand.u32 4294901760, %v7885_v28  ;;  %v9180_v47 = vand.u32 4294901760, %v7894_v20  ;;  %v1189_v17 = vand.u32 4294901760, %v1188_v10 }
 0x1ba   :  { %v1181_v46 = vsub.f32 %v7715_v27, %v9303_v59  ;;  %v1147_v27 = vand.u32 4294901760, %v1146_v55  ;;  %v9306_v55 = vand.u32 4294901760, %v7742_v0 }
 0x1bb   :  { %v6345_v13 = vpack.c.bf16 %v1175_v43, %v1168_v49  ;;  %v1136_v7 = vsub.f32 %v7885_v28, %v9178_v24  ;;  %v1156_v49 = vsub.f32 %v7894_v20, %v9180_v47  ;;  %v9304_v43 = vand.u32 4294901760, %v7726_v1 }
 0x1bc   :  { %v1182_v50 = vand.u32 4294901760, %v1181_v46  ;;  %v9305_v24 = vand.u32 4294901760, %v7734_v18  ;;  %v1216_v47 = vsub.f32 %v7742_v0, %v9306_v55  ;;  %v9313_v55 = vand.u32 4294901760, %v7814_v3 }
 0x1bd   :  { %v1137_v57 = vand.u32 4294901760, %v1136_v7  ;;  %v1202_v59 = vsub.f32 %v7726_v1, %v9304_v43  ;;  %v1157_v46 = vand.u32 4294901760, %v1156_v49  ;;  %v9307_v1 = vand.u32 4294901760, %v7755_v34 }
 0x1be   :  { %v1195_v12 = vsub.f32 %v7734_v18, %v9305_v24  ;;  %v6349_v40 = vpack.c.bf16 %v1189_v17, %v1182_v50  ;;  %v9308_v50 = vand.u32 4294901760, %v7762_v39  ;;  %v9309_v17 = vand.u32 4294901760, %v7774_v37 }
 0x1bf   :  { %v1203_v7 = vand.u32 4294901760, %v1202_v59  ;;  %v1209_v43 = vsub.f32 %v7755_v34, %v9307_v1  ;;  %v9310_v34 = vand.u32 4294901760, %v7782_v22  ;;  %v9311_v59 = vand.u32 4294901760, %v7795_v29 }
 0x1c0   :  { %6336 = vmatpush3.bf16.xpose.msra.mxu1 %v7856_v6  ;;  %v1196_v10 = vand.u32 4294901760, %v1195_v12  ;;  %v1230_v12 = vsub.f32 %v7762_v39, %v9308_v50  ;;  %v1251_v1 = vsub.f32 %v7814_v3, %v9313_v55  ;;  %v9316_v3 = vand.u32 4294901760, %v7660_v19 }
 0x1c1   :  { %6338 = vmatprep.subr.bf16.mxu1 %v7860_v32  ;;  %v1210_v24 = vand.u32 4294901760, %v1209_v43 }
 0x1c2   :  { %v6353_v18 = vpack.c.bf16 %v1203_v7, %v1196_v10 }
 0x1c8   :  { %6340 = vmatpush3.bf16.xpose.msra.mxu1 %v7860_v32 }
 0x1c9   :  { %6342 = vmatprep.subr.bf16.mxu1 %v7880_v51 }
 0x1d0   :  { %6344 = vmatpush3.bf16.xpose.msra.mxu1 %v7880_v51 }
 0x1d1   :  { %6346 = vmatprep.subr.bf16.mxu1 %v6345_v13 }
 0x1d7   :  { %5482 = vmatmul.mubr.f32.vlgmr.msra.gmra.mrb[0].mxu1 %v1137_v57  ;;  %v1223_v57 = vsub.f32 %v7774_v37, %v9309_v17  ;;  %v9312_v37 = vand.u32 4294901760, %v7802_v42 }
 0x1d8   :  { %5484 = vmatprep.mubr.f32.mxu1 %v1147_v27  ;;  %6348 = vmatpush3.bf16.xpose.msra.mxu1 %v6345_v13  ;;  %v1217_v13 = vand.u32 4294901760, %v1216_v47  ;;  %v1231_v27 = vand.u32 4294901760, %v1230_v12  ;;  %v1237_v47 = vsub.f32 %v7795_v29, %v9311_v59  ;;  %v9314_v29 = vand.u32 4294901760, %v7822_v44 }
 0x1d9   :  { %6350 = vmatprep.subr.bf16.mxu1 %v6349_v40  ;;  %v1224_v0 = vand.u32 4294901760, %v1223_v57  ;;  %v1258_v7 = vsub.f32 %v7802_v42, %v9312_v37 }
 0x1da   :  { %v6357_v49 = vpack.c.bf16 %v1217_v13, %v1210_v24  ;;  %v1238_v39 = vand.u32 4294901760, %v1237_v47  ;;  %v1272_v24 = vsub.f32 %v7822_v44, %v9314_v29  ;;  %v9315_v13 = vand.u32 4294901760, %v7835_v33 }
 0x1db   :  { %5485 = vmatmul.mubr.f32.gmra.mrb[2].mxu1 %v1157_v46  ;;  %v6361_v46 = vpack.c.bf16 %v1231_v27, %v1224_v0  ;;  %v9318_v44 = vand.u32 4294901760, %v7894_v20 }
 0x1dc   :  { %5519 = vmatprep.mubr.f32.mxu1 %v7653_v21  ;;  %v1265_v50 = vsub.f32 %v7835_v33, %v9315_v13  ;;  %v1273_v17 = vand.u32 4294901760, %v1272_v24 }
 0x1de   :  { %v1266_v42 = vand.u32 4294901760, %v1265_v50 }
 0x1e0   :  { %6352 = vmatpush3.bf16.xpose.msra.mxu1 %v6349_v40  ;;  %v1244_v40 = vsub.f32 %v7782_v22, %v9310_v34  ;;  %v1252_v22 = vand.u32 4294901760, %v1251_v1  ;;  %v6373_v57 = vpack.c.bf16 %v1273_v17, %v1266_v42 }
 0x1e1   :  { %6354 = vmatprep.subr.bf16.mxu1 %v6353_v18 }
 0x1e2   :  { %v1245_v10 = vand.u32 4294901760, %v1244_v40  ;;  %v7217_v40 = vmov 1.0|1.0  }
 0x1e4   :  { %v6365_v43 = vpack.c.bf16 %v1245_v10, %v1238_v39 }
 0x1e8   :  { %6356 = vmatpush3.bf16.xpose.msra.mxu1 %v6353_v18  ;;  %v1259_v18 = vand.u32 4294901760, %v1258_v7 }
 0x1e9   :  { %6358 = vmatprep.subr.bf16.mxu1 %v6357_v49 }
 0x1ea   :  { %v6369_v12 = vpack.c.bf16 %v1259_v18, %v1252_v22 }
 0x1f0   :  { %6360 = vmatpush3.bf16.xpose.msra.mxu1 %v6357_v49 }
 0x1f1   :  { %6362 = vmatprep.subr.bf16.mxu1 %v6361_v46 }
 0x1f8   :  { %6364 = vmatpush3.bf16.xpose.msra.mxu1 %v6361_v46 }
 0x1f9   :  { %6366 = vmatprep.subr.bf16.mxu1 %v6365_v43 }
 0x200   :  { %6368 = vmatpush3.bf16.xpose.msra.mxu1 %v6365_v43 }
 0x201   :  { %6370 = vmatprep.subr.bf16.mxu1 %v6369_v12 }
 0x208   :  { %6372 = vmatpush3.bf16.xpose.msra.mxu1 %v6369_v12 }
 0x209   :  { %6374 = vmatprep.subr.bf16.mxu1 %v6373_v57 }
 0x210   :  { %6376 = vmatpush3.bf16.xpose.msra.mxu1 %v6373_v57 }
 0x211   :  { %6378 = vmatprep.subr.bf16.mxu1 %v7706_v52 }
 0x217   :  { %5520 = vmatmul.mubr.f32.vlgmr.msra.gmra.mrb[0].mxu1 %v7868_v4 }
 0x218   :  { %5522 = vmatprep.mubr.f32.mxu1 %v7870_v35  ;;  %6380 = vmatpush3.bf16.xpose.msra.mxu1 %v7706_v52  ;;  %v9331_v52 = vld [vmem:[#allocation16_spill] sm:$0xff] }
 0x219   :  { %6382 = vmatprep.subr.bf16.mxu1 %v7722_v5 }
 0x21b   :  { %5523 = vmatmul.mubr.f32.gmra.mrb[2].mxu1 %v7887_v26 }
 0x21c   :  { %5557 = vmatprep.mubr.f32.mxu1 %v7660_v19  ;;  %v9328_v19 = vmov 0 }
 0x220   :  { %6384 = vmatpush3.bf16.xpose.msra.mxu1 %v7722_v5  ;;  %v9332_v5 = vld [vmem:[#allocation21_spill] sm:$0xff] }
 0x221   :  { %6386 = vmatprep.subr.bf16.mxu1 %v7747_v31 }
 0x228   :  { %6388 = vmatpush3.bf16.xpose.msra.mxu1 %v7747_v31  ;;  %v9334_v31 = vmov 0 }
 0x229   :  { %6390 = vmatprep.subr.bf16.mxu1 %v7766_v45 }
 0x230   :  { %6392 = vmatpush3.bf16.xpose.msra.mxu1 %v7766_v45 }
 0x231   :  { %6394 = vmatprep.subr.bf16.mxu1 %v7787_v53 }
 0x238   :  { %6396 = vmatpush3.bf16.xpose.msra.mxu1 %v7787_v53 }
 0x239   :  { %6398 = vmatprep.subr.bf16.mxu1 %v7806_v30 }
 0x240   :  { %6400 = vmatpush3.bf16.xpose.msra.mxu1 %v7806_v30 }
 0x241   :  { %6402 = vmatprep.subr.bf16.mxu1 %v7827_v41 }
 0x248   :  { %6404 = vmatpush3.bf16.xpose.msra.mxu1 %v7827_v41  ;;  %v9337_v41 = vld [vmem:[#allocation24_spill] sm:$0xff] }
 0x249   :  { %6406 = vmatprep.subr.bf16.mxu1 %v7848_v8 }
 0x250   :  { %6408 = vmatpush3.bf16.xpose.msra.mxu1 %v7848_v8  ;;  %v9317_v8 = vand.u32 4294901760, %v7885_v28 }
 0x251   :  { %6410 = vmatprep.subr.bf16.mxu1 %v7697_v60 }
 0x257   :  { %5558 = vmatmul.mubr.f32.vlgmr.msra.gmra.mrb[0].mxu1 %v7885_v28 }
 0x258   :  { %5560 = vmatprep.mubr.f32.mxu1 %v7890_v56  ;;  %6412 = vmatpush3.bf16.xpose.msra.mxu1 %v7697_v60  ;;  %v9323_v56 = vmov 0 }
 0x259   :  { %6414 = vmatprep.subr.bf16.mxu1 %v7713_v38 }
 0x25b   :  { %5561 = vmatmul.mubr.f32.gmra.mrb[2].mxu1 %v7894_v20 }
 0x25c   :  { %5595 = vmatprep.mubr.f32.mxu1 %v9316_v3 }
 0x260   :  { %6416 = vmatpush3.bf16.xpose.msra.mxu1 %v7713_v38 }
 0x261   :  { %6418 = vmatprep.subr.bf16.mxu1 %v7739_v9 }
 0x268   :  { %6420 = vmatpush3.bf16.xpose.msra.mxu1 %v7739_v9 }
 0x269   :  { %6422 = vmatprep.subr.bf16.mxu1 %v7778_v36 }
 0x270   :  { %6424 = vmatpush3.bf16.xpose.msra.mxu1 %v7778_v36 }
 0x271   :  { %6426 = vmatprep.subr.bf16.mxu1 %v7819_v58 }
 0x278   :  { %6428 = vmatpush3.bf16.xpose.msra.mxu1 %v7819_v58 }
 0x279   :  { %6430 = vmatprep.subr.bf16.mxu1 %v7856_v6 }
 0x280   :  { %6432 = vmatpush3.bf16.xpose.msra.mxu1 %v7856_v6 }
 0x281   :  { %6434 = vmatprep.subr.bf16.mxu1 %v7860_v32 }
 0x288   :  { %6436 = vmatpush3.bf16.xpose.msra.mxu1 %v7860_v32 }
 0x289   :  { %6438 = vmatprep.subr.bf16.mxu1 %v7880_v51 }
 0x290   :  { %6440 = vmatpush3.bf16.xpose.msra.mxu1 %v7880_v51 }
 0x291   :  { %6442 = vmatprep.subr.bf16.mxu1 %v7732_v23 }
 0x297   :  { %5596 = vmatmul.mubr.f32.vlgmr.msra.gmra.mrb[0].mxu1 %v9317_v8  ;;  %v9346_v8 = vld [vmem:[#allocation10_spill] sm:$0xff] }
 0x298   :  { %5598 = vmatprep.mubr.f32.mxu1 %v1145_v48  ;;  %6444 = vmatpush3.bf16.xpose.msra.mxu1 %v7732_v23  ;;  %v9322_v23 = vshra.s32 %v7366_v63, 5  ;;  %v9330_v63 = vld [vmem:[#allocation15_spill] sm:$0xff]  ;;  %v9344_v48 = vmov 0 }
 0x299   :  { %6446 = vmatprep.subr.bf16.mxu1 %v7753_v61  ;;  %v9345_v48 = vsel %vm8116_vm2, 4294967295, %v9344_v48 }
 0x29a   :  { %vm8048_vm14 = vcmp.eq.s32.totalorder %v9322_v23, %v7373_v2  ;;  %v9347_v23 = vld [vmem:[#allocation9_spill] sm:$0xff] }
 0x29b   :  { %5599 = vmatmul.mubr.f32.gmra.mrb[2].mxu1 %v9318_v44  ;;  %v9324_v56 = vsel %vm8048_vm14, 4294967295, %v9323_v56  ;;  %v690_v44 = vand.u32 31, %v9346_v8 }
 0x29c   :  { %5633 = vmatprep.mubr.f32.mxu1 %v7653_v21 }
 0x2a0   :  { %6448 = vmatpush3.bf16.xpose.msra.mxu1 %v7753_v61 }
 0x2a1   :  { %6450 = vmatprep.subr.bf16.mxu1 %v7772_v25 }
 0x2a8   :  { %6452 = vmatpush3.bf16.xpose.msra.mxu1 %v7772_v25 }
 0x2a9   :  { %6454 = vmatprep.subr.bf16.mxu1 %v7793_v14 }
 0x2b0   :  { %6456 = vmatpush3.bf16.xpose.msra.mxu1 %v7793_v14 }
 0x2b1   :  { %6458 = vmatprep.subr.bf16.mxu1 %v7812_v54 }
 0x2b8   :  { %6460 = vmatpush3.bf16.xpose.msra.mxu1 %v7812_v54 }
 0x2b9   :  { %6462 = vmatprep.subr.bf16.mxu1 %v7833_v11 }
 0x2c0   :  { %6464 = vmatpush3.bf16.xpose.msra.mxu1 %v7833_v11  ;;  %v8098_v11 = vsub.f32 %v9337_v41, %v9337_v41 }
 0x2c1   :  { %6466 = vmatprep.subr.bf16.mxu1 %v7843_v16 }
 0x2c2   :  { %v9211_v34 = vand.u32 4294901760, %v8098_v11 }
 0x2c4   :  { %v2035_v55 = vsub.f32 %v8098_v11, %v9211_v34 }
 0x2c6   :  { %v2036_v24 = vand.u32 4294901760, %v2035_v55 }
 0x2c8   :  { %6468 = vmatpush3.bf16.xpose.msra.mxu1 %v7843_v16 }
 0x2c9   :  { %6470 = vmatprep.subr.bf16.mxu1 %v7854_v15 }
 0x2d0   :  { %6472 = vmatpush3.bf16.xpose.msra.mxu1 %v7854_v15 }
 0x2d1   :  { %6474 = vmatprep.subr.bf16.mxu1 %v7697_v60 }
 0x2d7   :  { %5634 = vmatmul.mubr.f32.vlgmr.msra.gmra.mrb[0].mxu1 %v7868_v4 }
 0x2d8   :  { %5636 = vmatprep.mubr.f32.mxu1 %v7870_v35  ;;  %6476 = vmatpush3.bf16.xpose.msra.mxu1 %v7697_v60  ;;  %v8067_v60 = vsub.f32 %v9330_v63, %v9330_v63 }
 0x2d9   :  { %6478 = vmatprep.subr.bf16.mxu1 %v7713_v38 }
 0x2da   :  { %v9215_v14 = vand.u32 4294901760, %v8067_v60 }
 0x2db   :  { %5637 = vmatmul.mubr.f32.gmra.mrb[2].mxu1 %v7887_v26 }
 0x2dc   :  { %5671 = vmatprep.mubr.f32.mxu1 %v7653_v21  ;;  %v2014_v49 = vsub.f32 %v8067_v60, %v9215_v14 }
 0x2de   :  { %v2015_v10 = vand.u32 4294901760, %v2014_v49  ;;  %v7218_v49 = vmov -1e+30  }
 0x2e0   :  { %6480 = vmatpush3.bf16.xpose.msra.mxu1 %v7713_v38  ;;  %v8071_v38 = vsub.f32 %v9331_v52, %v9331_v52 }
 0x2e1   :  { %6482 = vmatprep.subr.bf16.mxu1 %v7739_v9 }
 0x2e2   :  { %v9214_v30 = vand.u32 4294901760, %v8071_v38 }
 0x2e4   :  { %v2021_v0 = vsub.f32 %v8071_v38, %v9214_v30 }
 0x2e6   :  { %v2022_v37 = vand.u32 4294901760, %v2021_v0 }
 0x2e8   :  { %6484 = vmatpush3.bf16.xpose.msra.mxu1 %v7739_v9  ;;  %v9333_v9 = vshra.s32 %v9332_v5, 5  ;;  %v6537_v18 = vpack.c.bf16 %v2022_v37, %v2015_v10 }
 0x2e9   :  { %6486 = vmatprep.subr.bf16.mxu1 %v7778_v36 }
 0x2ea   :  { %vm8076_vm0 = vcmp.eq.s32.totalorder %v9333_v9, %v7373_v2  ;;  %6538 = vmatprep.subr.bf16.mxu0 %v6537_v18  ;;  %v9349_v9 = vld [vmem:[#allocation11_spill] sm:$0xff] }
 0x2eb   :  { %v9335_v31 = vsel %vm8076_vm0, 4294967295, %v9334_v31  ;;  %6540 = vmatpush3.bf16.msra.mxu0 %v6537_v18  ;;  %v693_v41 = vshra.s32 %v9349_v9, 4 }
 0x2f0   :  { %6488 = vmatpush3.bf16.xpose.msra.mxu1 %v7778_v36  ;;  %v9320_v36 = vmov 0 }
 0x2f1   :  { %6490 = vmatprep.subr.bf16.mxu1 %v7819_v58 }
 0x2f8   :  { %6492 = vmatpush3.bf16.xpose.msra.mxu1 %v7819_v58  ;;  %v9319_v58 = vshra.s32 %v7363_v62, 5  ;;  %v9326_v62 = vld [vmem:[#allocation18_spill] sm:$0xff] }
 0x2f9   :  { %6494 = vmatprep.subr.bf16.mxu1 %v7856_v6  ;;  %v9327_v28 = vshra.s32 %v9326_v62, 5  ;;  %v692_v62 = vshra.s32 %v9347_v23, 4 }
 0x2fa   :  { %vm8041_vm12 = vcmp.eq.s32.totalorder %v9319_v58, %v7373_v2  ;;  %v700_v58 = vand.u32 15, %v690_v44 }
 0x2fb   :  { %v9321_v36 = vsel %vm8041_vm12, 4294967295, %v9320_v36  ;;  %vm8061_vm5 = vcmp.eq.s32.totalorder %v9327_v28, %v7373_v2  ;;  %v9336_v2 = vld [vmem:[#allocation23_spill] sm:$0xff]  ;;  %v695_v28 = vshra.s32 %v690_v44, 4 }
 0x2fc   :  { %v9329_v19 = vsel %vm8061_vm5, 4294967295, %v9328_v19  ;;  %v8094_v54 = vsub.f32 %v9336_v2, %v9336_v2 }
 0x2fd   :  { %vm697_vm3 = vcmp.eq.s32.totalorder %v692_v62, %v695_v28  ;;  %vm698_vm7 = vcmp.eq.s32.totalorder %v693_v41, %v695_v28  ;;  %v9354_v62 = vld [vmem:[#allocation35_spill] sm:$0xff] }
 0x2fe   :  { %v9212_v27 = vand.u32 4294901760, %v8094_v54 }
 0x300   :  { %6496 = vmatpush3.bf16.xpose.msra.mxu1 %v7856_v6  ;;  %v2028_v7 = vsub.f32 %v8094_v54, %v9212_v27 }
 0x301   :  { %6498 = vmatprep.subr.bf16.mxu1 %v7860_v32 }
 0x302   :  { %v2029_v29 = vand.u32 4294901760, %v2028_v7 }
 0x304   :  { %v6541_v12 = vpack.c.bf16 %v2036_v24, %v2029_v29 }
 0x306   :  { %6542 = vmatprep.subr.bf16.mxu0 %v6541_v12 }
 0x307   :  { %6544 = vmatpush3.bf16.msra.mxu0 %v6541_v12 }
 0x308   :  { %6500 = vmatpush3.bf16.xpose.msra.mxu1 %v7860_v32 }
 0x309   :  { %6502 = vmatprep.subr.bf16.mxu1 %v7880_v51 }
 0x310   :  { %6504 = vmatpush3.bf16.xpose.msra.mxu1 %v7880_v51  ;;  %v9325_v51 = vmov 0.0  }
 0x311   :  { %v4814_v21 = vsel %vm8041_vm12, 1.0, %v9325_v51  ;;  %v4816_v25 = vsel %vm8061_vm5, 1.0, %v9325_v51  ;;  %v4817_v53 = vsel %vm8076_vm0, 1.0, %v9325_v51  ;;  %6506 = vmatprep.subr.msk.bf16.mxu1 %vm8104_vm9, %v7217_v40 }
 0x312   :  { %v8080_v61 = vsub.f32 %v4814_v21, %v4814_v21  ;;  %v8110_v32 = vsub.f32 %v4816_v25, %v4816_v25  ;;  %v8141_v39 = vsub.f32 %v4817_v53, %v4817_v53  ;;  %v9348_v21 = vld [vmem:[#allocation8_spill] sm:$0xff]  ;;  %v703_v25 = vand.u32 15, %v9349_v9 }
 0x313   :  { %v691_v52 = vshra.s32 %v9348_v21, 4  ;;  %v9350_v53 = vld [vmem:[#allocation12_spill] sm:$0xff] }
 0x314   :  { %v9209_v15 = vand.u32 4294901760, %v8080_v61  ;;  %v9207_v46 = vand.u32 4294901760, %v8110_v32  ;;  %v9206_v22 = vand.u32 4294901760, %v8141_v39  ;;  %v704_v2 = vand.u32 15, %v9350_v53 }
 0x315   :  { %vm696_vm8 = vcmp.eq.s32.totalorder %v691_v52, %v695_v28  ;;  %v707_v33 = vsub.s32 %v700_v58, %v703_v25  ;;  %v694_v16 = vshra.s32 %v9350_v53, 4  ;;  %v9355_v25 = vld [vmem:[#allocation17_spill] sm:$0xff] }
 0x316   :  { %v2042_v59 = vsub.f32 %v8080_v61, %v9209_v15  ;;  %v2056_v13 = vsub.f32 %v8110_v32, %v9207_v46  ;;  %v2063_v50 = vsub.f32 %v8141_v39, %v9206_v22 }
 0x317   :  { %5672 = vmatmul.mubr.f32.vlgmr.msra.gmra.mrb[0].mxu1 %v7868_v4  ;;  %v9340_v4 = vmov 0  ;;  %vm711_vm6 = vcmp.ge.s32.totalorder %v707_v33, 4294967292  ;;  %vm719_vm5 = vcmp.le.s32.totalorder %v707_v33, 4  ;;  %v9356_v33 = vld [vmem:[#allocation39_spill] sm:$0xff] }
 0x318   :  { %5674 = vmatprep.mubr.f32.mxu1 %v7870_v35  ;;  %v9341_v4 = vsel %vm8104_vm9, 4294967295, %v9340_v4  ;;  %6508 = vmatpush3.bf16.msk.msra.mxu1 %vm8104_vm9, %v7217_v40  ;;  %v2043_v1 = vand.u32 4294901760, %v2042_v59  ;;  %v2057_v17 = vand.u32 4294901760, %v2056_v13  ;;  %v2064_v57 = vand.u32 4294901760, %v2063_v50  ;;  %vm715_vm0 = vmand %vm698_vm7, %vm711_vm6 }
 0x319   :  { %6510 = vmatprep.subr.msk.bf16.mxu1 %vm8116_vm2, %v7217_v40  ;;  %v708_v35 = vsub.s32 %v700_v58, %v704_v2  ;;  %vm9365_vm7 = vnez %v9329_v19 }
 0x31a   :  { %v6549_v3 = vpack.c.bf16 %v2064_v57, %v2057_v17  ;;  %v9352_v57 = vld [vmem:[#allocation30_spill] sm:$0xff] }
 0x31b   :  { %5675 = vmatmul.mubr.f32.gmra.mrb[2].mxu1 %v7887_v26  ;;  %v4815_v26 = vsel %vm8048_vm14, 1.0, %v9325_v51  ;;  %v702_v51 = vand.u32 15, %v9347_v23  ;;  %vm699_vm14 = vcmp.eq.s32.totalorder %v694_v16, %v695_v28  ;;  %vm712_vm12 = vcmp.ge.s32.totalorder %v708_v35, 4294967292 }
 0x31c   :  { %v8082_v45 = vsub.f32 %v4815_v26, %v4815_v26  ;;  %6512 = vmatpush3.bf16.msk.msra.mxu1 %vm8116_vm2, %v7217_v40  ;;  %v701_v26 = vand.u32 15, %v9348_v21  ;;  %v8205_v28 = vsub.f32 %v9354_v62, %v9354_v62  ;;  %v8219_v16 = vsub.f32 %v9356_v33, %v9356_v33  ;;  %v9377_v33 = vld [vmem:[#allocation32_spill] sm:$0xff] }
 0x31d   :  { %v706_v63 = vsub.s32 %v700_v58, %v702_v51  ;;  %v9353_v51 = vld [vmem:[#allocation34_spill] sm:$0xff] }
 0x31e   :  { %v9208_v6 = vand.u32 4294901760, %v8082_v45  ;;  %v705_v5 = vsub.s32 %v700_v58, %v701_v26  ;;  %v8201_v26 = vsub.f32 %v9353_v51, %v9353_v51  ;;  %v9202_v9 = vand.u32 4294901760, %v8205_v28  ;;  %v9369_v51 = vld [vmem:[#allocation26_spill] sm:$0xff] }
 0x31f   :  { %vm710_vm4 = vcmp.ge.s32.totalorder %v706_v63, 4294967292  ;;  %vm718_vm9 = vcmp.le.s32.totalorder %v706_v63, 4 }
 0x320   :  { %v2049_v47 = vsub.f32 %v8082_v45, %v9208_v6  ;;  %vm709_vm10 = vcmp.ge.s32.totalorder %v705_v5, 4294967292  ;;  %vm714_vm2 = vmand %vm697_vm3, %vm710_vm4  ;;  %vm717_vm11 = vcmp.le.s32.totalorder %v705_v5, 4  ;;  %v9203_v5 = vand.u32 4294901760, %v8201_v26 }
 0x321   :  { %vm713_vm13 = vmand %vm696_vm8, %vm709_vm10  ;;  %vm720_vm8 = vcmp.le.s32.totalorder %v708_v35, 4  ;;  %v2091_v41 = vsub.f32 %v8205_v28, %v9202_v9  ;;  %v9357_v35 = vld [vmem:[#allocation40_spill] sm:$0xff] }
 0x322   :  { %v2050_v43 = vand.u32 4294901760, %v2049_v47  ;;  %vm722_vm1 = vmand %vm714_vm2, %vm718_vm9  ;;  %v2084_v2 = vsub.f32 %v8201_v26, %v9203_v5 }
 0x323   :  { %vm721_vm15 = vmand %vm713_vm13, %vm717_vm11  ;;  %v726_v0 = vsel %vm722_vm1, 0.0, %v7218_v49  ;;  %vm9366_vm11 = vnez %v9335_v31 }
 0x324   :  { %v6545_v42 = vpack.c.bf16 %v2050_v43, %v2043_v1  ;;  %v725_v10 = vsel %vm721_vm15, 0.0, %v7218_v49  ;;  %vm723_vm3 = vmand %vm715_vm0, %vm719_vm5  ;;  %vm9358_vm0 = vnez %v9321_v36  ;;  %vm9359_vm15 = vnez %v9324_v56 }
 0x325   :  { %vm716_vm4 = vmand %vm699_vm14, %vm712_vm12  ;;  %v727_v18 = vsel %vm723_vm3, 0.0, %v7218_v49  ;;  %vm9378_vm14 = vnez %v9377_v33 }
 0x326   :  { %6546 = vmatprep.subr.bf16.mxu0 %v6545_v42  ;;  %vm724_vm1 = vmand %vm716_vm4, %vm720_vm8 }
 0x327   :  { %6548 = vmatpush3.bf16.msra.mxu0 %v6545_v42  ;;  %v728_v50 = vsel %vm724_vm1, 0.0, %v7218_v49  ;;  %v9351_v42 = vld [vmem:[#allocation29_spill] sm:$0xff]  ;;  %vm8229_vm6 = vmpackc.low %vm9359_vm15, %vm9358_vm0 }
 0x328   :  { %6550 = vmatprep.subr.bf16.mxu0 %v6549_v3  ;;  %v8185_v17 = vsub.f32 %v9351_v42, %v9351_v42  ;;  %6514 = vmatprep.subr.msk.bf16.mxu1 %vm8229_vm6, %v7217_v40  ;;  %vm8261_vm13 = vmpackc.low %vm9366_vm11, %vm9365_vm7  ;;  %vm9403_vm7 = vnez %v9341_v4  ;;  %vm9404_vm11 = vnez %v9345_v48 }
 0x329   :  { %6516 = vmatpush3.bf16.msk.msra.mxu1 %vm8229_vm6, %v7217_v40 }
 0x32a   :  { %v9205_v8 = vand.u32 4294901760, %v8185_v17  ;;  %6518 = vmatprep.subr.msk.bf16.mxu1 %vm8261_vm13, %v7217_v40 }
 0x32b   :  { %6552 = vmatpush3.bf16.msra.mxu0 %v6549_v3  ;;  %v8189_v3 = vsub.f32 %v9352_v57, %v9352_v57 }
 0x32c   :  { %v2070_v58 = vsub.f32 %v8185_v17, %v9205_v8 }
 0x32d   :  { %v9204_v44 = vand.u32 4294901760, %v8189_v3  ;;  %6520 = vmatpush3.bf16.msk.msra.mxu1 %vm8261_vm13, %v7217_v40 }
 0x32e   :  { %v2071_v63 = vand.u32 4294901760, %v2070_v58 }
 0x32f   :  { %v2077_v23 = vsub.f32 %v8189_v3, %v9204_v44 }
 0x331   :  { %v2078_v52 = vand.u32 4294901760, %v2077_v23 }
 0x333   :  { %v6553_v53 = vpack.c.bf16 %v2078_v52, %v2071_v63  ;;  %v9370_v63 = vld [vmem:[#allocation27_spill] sm:$0xff]  ;;  %v9372_v52 = vld [vmem:[#allocation28_spill] sm:$0xff] }
 0x334   :  { %vm9371_vm2 = vnez %v9370_v63  ;;  %vm9373_vm9 = vnez %v9372_v52  ;;  %v8358_v63 = vpack.c.bf16 %v8205_v28, %v8201_v26 }
 0x335   :  { %6554 = vmatprep.subr.bf16.mxu0 %v6553_v53  ;;  %vm8285_vm12 = vmpackc.low %vm9373_vm9, %vm9371_vm2 }
 0x336   :  { %6556 = vmatpush3.bf16.msra.mxu0 %v6553_v53  ;;  %6522 = vmatprep.subr.msk.bf16.mxu1 %vm8285_vm12, %v7217_v40 }
 0x337   :  { %6524 = vmatpush3.bf16.msk.msra.mxu1 %vm8285_vm12, %v7217_v40 }
 0x3ea   :  { %v5673_v20 = vpop.f32.mrb[0].mxu1 }
 0x3eb   :  { %v1813_v59 = vmul.f32 0.35355338, %v5673_v20  ;;  %v1790_v47 = vpop.f32.mrb[1].mxu1  ;;  %v8223_v20 = vsub.f32 %v9357_v35, %v9357_v35  ;;  %v9379_v35 = vld [vmem:[#allocation33_spill] sm:$0xff] }
 0x3ec   :  { %v1812_v37 = vmul.f32 0.35355338, %v1790_v47  ;;  %v9201_v47 = vand.u32 4294901760, %v8219_v16  ;;  %vm9380_vm5 = vnez %v9379_v35 }
 0x3ed   :  { %v8171_v7 = vadd.f32 %v1813_v59, %v726_v0  ;;  %v2085_v0 = vand.u32 4294901760, %v2084_v2  ;;  %v2092_v59 = vand.u32 4294901760, %v2091_v41  ;;  %v9376_v41 = vld [vmem:[#allocation36_spill] sm:$0xff]  ;;  %vm8298_vm10 = vmpackc.low %vm9380_vm5, %vm9378_vm14  ;;  %v8362_v52 = vpack.c.bf16 %v8223_v20, %v8219_v16 }
 0x3ee   :  { %v5676_v55 = vpop.f32.mrb[2].mxu1  ;;  %v8173_v1 = vadd.f32 %v1812_v37, %v725_v10  ;;  %v9200_v10 = vand.u32 4294901760, %v8223_v20  ;;  %v9362_v37 = vld [vmem:[#allocation19_spill] sm:$0xff]  ;;  %v2098_v56 = vsub.f32 %v8219_v16, %v9201_v47  ;;  %6526 = vmatprep.subr.msk.bf16.mxu1 %vm8298_vm10, %v7217_v40 }
 0x3ef   :  { %1822 = vmax.xlane.f32.xlu1 %v8171_v7  ;;  %v1802_v43 = vpop.f32.mrb[3].mxu1  ;;  %v1815_v24 = vmul.f32 0.35355338, %v5676_v55  ;;  %v6557_v36 = vpack.c.bf16 %v2092_v59, %v2085_v0  ;;  %v9363_v55 = vld [vmem:[#allocation44_spill] sm:$0xff]  ;;  %6528 = vmatpush3.bf16.msk.msra.mxu1 %vm8298_vm10, %v7217_v40 }
 0x3f0   :  { %v1814_v29 = vmul.f32 0.35355338, %v1802_v43  ;;  %1820 = vmax.xlane.f32.xlu0 %v8173_v1  ;;  %v8248_v43 = vsub.f32 %v9363_v55, %v9363_v55  ;;  %v2099_v42 = vand.u32 4294901760, %v2098_v56  ;;  %v8314_v56 = vpack.c.bf16 %v8071_v38, %v8067_v60  ;;  %v9385_v55 = vld [vmem:[#allocation37_spill] sm:$0xff] }
 0x3f1   :  { %v8180_v12 = vadd.f32 %v1815_v24, %v728_v50  ;;  %6558 = vmatprep.subr.bf16.mxu0 %v6557_v36  ;;  %vm9386_vm3 = vnez %v9385_v55 }
 0x3f2   :  { %v8177_v13 = vadd.f32 %v1814_v29, %v727_v18  ;;  %v2105_v18 = vsub.f32 %v8223_v20, %v9200_v10  ;;  %v9364_v29 = vld [vmem:[#allocation45_spill] sm:$0xff]  ;;  %v9199_v57 = vand.u32 4294901760, %v8248_v43  ;;  %6560 = vmatpush3.bf16.msra.mxu0 %v6557_v36  ;;  %v9384_v36 = vld [vmem:[#allocation46_spill] sm:$0xff] }
 0x3f3   :  { %v8255_v24 = vsub.f32 %v9364_v29, %v9364_v29 }
 0x3f4   :  { %1824 = vmax.xlane.f32.xlu0 %v8177_v13  ;;  %v2106_v58 = vand.u32 4294901760, %v2105_v18  ;;  %v2112_v19 = vsub.f32 %v8248_v43, %v9199_v57  ;;  %v9387_v18 = vld [vmem:[#allocation38_spill] sm:$0xff] }
 0x3f5   :  { %v9198_v23 = vand.u32 4294901760, %v8255_v24  ;;  %vm9388_vm4 = vnez %v9387_v18 }
 0x3f6   :  { %v6561_v31 = vpack.c.bf16 %v2106_v58, %v2099_v42  ;;  %v2113_v53 = vand.u32 4294901760, %v2112_v19  ;;  %vm8320_vm8 = vmpackc.low %vm9388_vm4, %vm9386_vm3  ;;  %v9391_v42 = vld [vmem:[#allocation31_spill] sm:$0xff]  ;;  %v9392_v58 = vld [vmem:[#allocation42_spill] sm:$0xff] }
 0x3f7   :  { %v2119_v62 = vsub.f32 %v8255_v24, %v9198_v23  ;;  %6530 = vmatprep.subr.msk.bf16.mxu1 %vm8320_vm8, %v7217_v40  ;;  %vm9393_vm1 = vnez %v9392_v58  ;;  %v9400_v23 = vld [vmem:[#allocation48_spill] sm:$0xff] }
 0x3f8   :  { %1826 = vmax.xlane.f32.xlu0 %v8180_v12  ;;  %6562 = vmatprep.subr.bf16.mxu0 %v6561_v31 }
 0x3f9   :  { %v2120_v2 = vand.u32 4294901760, %v2119_v62  ;;  %6564 = vmatpush3.bf16.msra.mxu0 %v6561_v31  ;;  %6532 = vmatpush3.bf16.msk.msra.mxu1 %vm8320_vm8, %v7217_v40  ;;  %v9398_v31 = vld [vmem:[#allocation41_spill] sm:$0xff]  ;;  %v8354_v62 = vpack.c.bf16 %v8189_v3, %v8185_v17 }
 0x3fb   :  { %v6565_v59 = vpack.c.bf16 %v2120_v2, %v2113_v53  ;;  %v8366_v53 = vpack.c.bf16 %v8255_v24, %v8248_v43 }
 0x3fd   :  { %6566 = vmatprep.subr.bf16.mxu0 %v6565_v59 }
 0x3fe   :  { %6568 = vmatpush3.bf16.msra.mxu0 %v6565_v59 }
 0x3ff   :  { %6570 = vmatprep.subr.bf16.mxu0 %v8314_v56 }
 0x400   :  { %7120 = vrot.lane.b32.xlu1 %v9355_v25, %s7219_s15 }
 0x404   :  { %7130 = vrot.lane.b32.xlu1 %v9362_v37, %s7219_s15  ;;  %v9383_v37 = vld [vmem:[#allocation25_spill] sm:$0xff] }
 0x408   :  { %7135 = vrot.lane.b32.xlu1 %v9369_v51, %s7219_s15  ;;  %v9394_v51 = vld [vmem:[#allocation43_spill] sm:$0xff] }
 0x409   :  { %vm9395_vm0 = vnez %v9394_v51  ;;  %v9399_v51 = vld [vmem:[#allocation47_spill] sm:$0xff] }
 0x40a   :  { %vm8337_vm15 = vmpackc.low %vm9395_vm0, %vm9393_vm1 }
 0x40b   :  { %6534 = vmatprep.subr.msk.bf16.mxu1 %vm8337_vm15, %v7217_v40 }
 0x40c   :  { %7145 = vrot.lane.b32.xlu1 %v9376_v41, %s7219_s15  ;;  %6536 = vmatpush3.bf16.msk.msra.mxu1 %vm8337_vm15, %v7217_v40 }
 0x40e   :  { %7125 = vrot.lane.b32.xlu0 %v9383_v37, %s7219_s15 }
 0x410   :  { %7155 = vrot.lane.b32.xlu1 %v9384_v36, %s7219_s15 }
 0x412   :  { %7140 = vrot.lane.b32.xlu0 %v9391_v42, %s7219_s15 }
 0x416   :  { %7150 = vrot.lane.b32.xlu0 %v9398_v31, %s7219_s15 }
 0x47c   :  { %v1823_v2 = vpop.xlane.xlu1 %1822 }
 0x47d   :  { %v1829_v41 = vsub.f32 %v8171_v7, %v1823_v2  ;;  %v1821_v33 = vpop.xlane.xlu0 %1820 }
 0x47e   :  { %v1828_v35 = vsub.f32 %v8173_v1, %v1821_v33 }
 0x47f   :  { %v1834_v59 = vmul.f32 1.442695, %v1829_v41 }
 0x480   :  { %v1832_v37 = vmul.f32 1.442695, %v1828_v35  ;;  %v7121_v36 = vpop.permute.xlu1 %7120 }
 0x481   :  { %7159 = vpow2.f32 %v1834_v59  ;;  %v7123_v55 = vunpack.i.h.bf16 %v7121_v36  ;;  %v7122_v18 = vunpack.i.l.bf16 %v7121_v36  ;;  %v1825_v42 = vpop.xlane.xlu0 %1824 }
 0x482   :  { %7161 = vpow2.f32 %v1832_v37  ;;  %v1830_v58 = vsub.f32 %v8177_v13, %v1825_v42  ;;  %v9401_v42 = vld [vmem:[#allocation49_spill] sm:$0xff] }
 0x483   :  { %v935_v31 = vmul.f32 %v7123_v55, %v9399_v51  ;;  %v934_v57 = vmul.f32 %v7122_v18, %v9400_v23 }
 0x484   :  { %v1836_v10 = vmul.f32 1.442695, %v1830_v58  ;;  %v7131_v1 = vpop.permute.xlu1 %7130 }
 0x485   :  { %2689 = vrot.lane.b32.xlu1 %v935_v31, %s7219_s15  ;;  %2687 = vrot.lane.b32.xlu0 %v934_v57, %s7219_s15  ;;  %v1827_v7 = vpop.xlane.xlu0 %1826  ;;  %v7133_v37 = vunpack.i.h.bf16 %v7131_v1  ;;  %v7132_v55 = vunpack.i.l.bf16 %v7131_v1  ;;  %v9402_v57 = vld [vmem:[#allocation50_spill] sm:$0xff] }
 0x486   :  { %7163 = vpow2.f32 %v1836_v10  ;;  %v1831_v2 = vsub.f32 %v8180_v12, %v1827_v7 }
 0x488   :  { %v1838_v41 = vmul.f32 1.442695, %v1831_v2  ;;  %v7136_v18 = vpop.permute.xlu1 %7135  ;;  %v6573_v2 = vpack.c.bf16 %v8098_v11, %v8094_v54 }
 0x489   :  { %v7126_v33 = vpop.permute.xlu0 %7125  ;;  %v7138_v1 = vunpack.i.h.bf16 %v7136_v18 }
 0x48a   :  { %7165 = vpow2.f32 %v1838_v41  ;;  %v7128_v35 = vunpack.i.h.bf16 %v7126_v33  ;;  %v7127_v59 = vunpack.i.l.bf16 %v7126_v33 }
 0x48b   :  { %v8376_v13 = vpop.eup %7159 }
 0x48c   :  { %v8378_v36 = vpop.eup %7161  ;;  %v937_v58 = vmul.f32 %v7128_v35, %v9401_v42  ;;  %v936_v31 = vmul.f32 %v7127_v59, %v9402_v57  ;;  %v8383_v10 = vand.u32 4294901760, %v8376_v13  ;;  %v939_v35 = vmul.f32 %v7133_v37, %v9399_v51 }
 0x48d   :  { %v8386_v12 = vand.u32 4294901760, %v8378_v36  ;;  %v938_v59 = vmul.f32 %v7132_v55, %v9400_v23  ;;  %v7141_v47 = vpop.permute.xlu0 %7140  ;;  %v941_v55 = vmul.f32 %v7138_v1, %v9401_v42 }
 0x48e   :  { %2693 = vrot.lane.b32.xlu1 %v937_v58, %s7219_s15  ;;  %2691 = vrot.lane.b32.xlu0 %v936_v31, %s7219_s15  ;;  %v8392_v7 = vsub.f32 %v8376_v13, %v8383_v10  ;;  %v7137_v58 = vunpack.i.l.bf16 %v7136_v18  ;;  %v6577_v18 = vpack.c.bf16 %v8082_v45, %v8080_v61  ;;  %v7143_v8 = vunpack.i.h.bf16 %v7141_v47 }
 0x48f   :  { %5747 = vmatprep.mubr.f32.mxu0 %v8386_v12  ;;  %v8399_v41 = vsub.f32 %v8378_v36, %v8386_v12  ;;  %v7142_v22 = vunpack.i.l.bf16 %v7141_v47  ;;  %v6581_v47 = vpack.c.bf16 %v8141_v39, %v8110_v32 }
 0x490   :  { %v8401_v33 = vpop.eup %7163  ;;  %5748 = vmatmul.mubr.f32.vlgmr.msra.gmra.mrb[4].mxu0 %v8383_v10  ;;  %v9210_v31 = vand.u32 4294901760, %v8392_v7 }
 0x491   :  { %6572 = vmatpush3.bf16.msra.mxu0 %v8314_v56  ;;  %v8409_v9 = vand.u32 4294901760, %v8401_v33  ;;  %v9216_v5 = vand.u32 4294901760, %v8399_v41 }
 0x492   :  { %2697 = vrot.lane.b32.xlu1 %v939_v35, %s7219_s15  ;;  %2695 = vrot.lane.b32.xlu0 %v938_v59, %s7219_s15  ;;  %v1983_v37 = vsub.f32 %v8392_v7, %v9210_v31  ;;  %v940_v35 = vmul.f32 %v7137_v58, %v9402_v57  ;;  %v7146_v59 = vpop.permute.xlu1 %7145 }
 0x493   :  { %5750 = vmatprep.mubr.f32.mxu0 %v8409_v9  ;;  %6574 = vmatprep.subr.bf16.mxu0 %v6573_v2  ;;  %v1973_v56 = vsub.f32 %v8399_v41, %v9216_v5  ;;  %v8429_v1 = vsub.f32 %v8401_v33, %v8409_v9  ;;  %v7148_v58 = vunpack.i.h.bf16 %v7146_v59  ;;  %v7147_v34 = vunpack.i.l.bf16 %v7146_v59  ;;  %v7151_v59 = vpop.permute.xlu0 %7150 }
 0x494   :  { %v8424_v44 = vpop.eup %7165  ;;  %v1984_v15 = vand.u32 4294901760, %v1983_v37  ;;  %v943_v37 = vmul.f32 %v7143_v8, %v9399_v51  ;;  %v7153_v14 = vunpack.i.h.bf16 %v7151_v59  ;;  %v7152_v5 = vunpack.i.l.bf16 %v7151_v59 }
 0x495   :  { %6576 = vmatpush3.bf16.msra.mxu0 %v6573_v2  ;;  %v1974_v46 = vand.u32 4294901760, %v1973_v56  ;;  %v8432_v6 = vand.u32 4294901760, %v8424_v44  ;;  %v9213_v31 = vand.u32 4294901760, %v8429_v1  ;;  %v942_v56 = vmul.f32 %v7142_v22, %v9400_v23 }
 0x496   :  { %2701 = vrot.lane.b32.xlu1 %v941_v55, %s7219_s15  ;;  %2699 = vrot.lane.b32.xlu0 %v940_v35, %s7219_s15  ;;  %v46_v55 = vld [vmem:[%s9125_s2 + $0x20] sm:$0xff]  ;;  %v7156_v30 = vpop.permute.xlu1 %7155  ;;  %v946_v59 = vmul.f32 %v7152_v5, %v9400_v23  ;;  %v682_v5 = vmax.f32 %v9401_v42, 0.0 }
 0x497   :  { %5709 = vmatprep.mubr.f32.mxu1 %v1974_v46  ;;  %5751 = vmatmul.mubr.f32.gmra.mrb[6].mxu0 %v8432_v6  ;;  %v8442_v2 = vsub.f32 %v8424_v44, %v8432_v6  ;;  %v1993_v46 = vsub.f32 %v8429_v1, %v9213_v31  ;;  %v8452_v35 = vand.u32 4294901760, %v46_v55 }
 0x498   :  { %6578 = vmatprep.subr.bf16.mxu0 %v6577_v18  ;;  %5710 = vmatmul.mubr.f32.vlgmr.msra.gmra.mrb[4].mxu1 %v1984_v15  ;;  %v945_v15 = vmul.f32 %v7148_v58, %v9401_v42 }
 0x499   :  { %6580 = vmatpush3.bf16.msra.mxu0 %v6577_v18  ;;  %5785 = vmatprep.mubr.f32.mxu0 %v8399_v41  ;;  %v2002_v27 = vand.u32 4294901760, %v8442_v2  ;;  %v1994_v8 = vand.u32 4294901760, %v1993_v46  ;;  %v8459_v22 = vsub.f32 %v46_v55, %v8452_v35  ;;  %v944_v18 = vmul.f32 %v7147_v34, %v9402_v57 }
 0x49a   :  { %2705 = vrot.lane.b32.xlu1 %v943_v37, %s7219_s15  ;;  %2703 = vrot.lane.b32.xlu0 %v942_v56, %s7219_s15  ;;  %v7158_v55 = vunpack.i.h.bf16 %v7156_v30  ;;  %v7157_v34 = vunpack.i.l.bf16 %v7156_v30  ;;  %v947_v46 = vmul.f32 %v7153_v14, %v9399_v51  ;;  %v680_v14 = vmax.f32 %v9399_v51, 0.0 }
 0x49b   :  { %6582 = vmatprep.subr.bf16.mxu0 %v6581_v47  ;;  %v2003_v31 = vsub.f32 %v8442_v2, %v2002_v27  ;;  %5712 = vmatprep.mubr.f32.mxu1 %v1994_v8  ;;  %v8467_v37 = vand.u32 4294901760, %v8459_v22  ;;  %v679_v30 = vmax.f32 %v9400_v23, 0.0  ;;  %v9405_v23 = vand.u32 4294901760, %v8399_v41 }
 0x49c   :  { %v9408_v51 = vand.u32 4294901760, %v8094_v54  ;;  %v9410_v41 = vand.u32 4294901760, %v8392_v7  ;;  %v9414_v54 = vand.u32 4294901760, %v8110_v32  ;;  %v9420_v32 = vand.u32 4294901760, %v8219_v16 }
 0x49d   :  { %6584 = vmatpush3.bf16.msra.mxu0 %v6581_v47  ;;  %v2004_v56 = vand.u32 4294901760, %v2003_v31  ;;  %v3640_v58 = vsub.f32 %v8459_v22, %v8467_v37  ;;  %v949_v31 = vmul.f32 %v7158_v55, %v9401_v42  ;;  %v948_v47 = vmul.f32 %v7157_v34, %v9402_v57 }
 0x49e   :  { %2709 = vrot.lane.b32.xlu1 %v945_v15, %s7219_s15  ;;  %2707 = vrot.lane.b32.xlu0 %v944_v18, %s7219_s15  ;;  %v9409_v42 = vand.u32 4294901760, %v8098_v11  ;;  %v9411_v15 = vand.u32 4294901760, %v8429_v1  ;;  %v9415_v11 = vand.u32 4294901760, %v8141_v39  ;;  %v9421_v39 = vand.u32 4294901760, %v8223_v20 }
 0x49f   :  { %5713 = vmatmul.mubr.f32.gmra.mrb[6].mxu1 %v2004_v56  ;;  %6586 = vmatprep.subr.bf16.mxu0 %v8354_v62  ;;  %v3641_v8 = vand.u32 4294901760, %v3640_v58 }
 0x4a0   :  { %v6657_v58 = vpack.c.bf16 %v9421_v39, %v9420_v32 }
 0x4a1   :  { %6588 = vmatpush3.bf16.msra.mxu0 %v8354_v62  ;;  %6141 = vmatprep.subr.mxu1 %v3641_v8  ;;  %v681_v62 = vmax.f32 %v9402_v57, 0.0  ;;  %v6637_v57 = vpack.c.bf16 %v9409_v42, %v9408_v51 }
 0x4a2   :  { %2713 = vrot.lane.b32.xlu1 %v947_v46, %s7219_s15  ;;  %2711 = vrot.lane.b32.xlu0 %v946_v59, %s7219_s15 }
 0x4a3   :  { %6590 = vmatprep.subr.bf16.mxu0 %v8358_v63  ;;  %6142 = vmatpush3.msra.mxu1 %v3641_v8 }
 0x4a4   :  { %6149 = vmatprep.subr.mxu1 %v8459_v22 }
 0x4a5   :  { %6592 = vmatpush3.bf16.msra.mxu0 %v8358_v63  ;;  %v9406_v63 = vand.u32 4294901760, %v8067_v60  ;;  %v9412_v60 = vand.u32 4294901760, %v8080_v61  ;;  %v9417_v61 = vand.u32 4294901760, %v8189_v3  ;;  %v9423_v3 = vand.u32 4294901760, %v8255_v24 }
 0x4a6   :  { %2717 = vrot.lane.b32.xlu1 %v949_v31, %s7219_s15  ;;  %2715 = vrot.lane.b32.xlu0 %v948_v47, %s7219_s15  ;;  %s4878_s15 = sld [smem:[#allocation2 + $0x5]] }
 0x4a7   :  { %6594 = vmatprep.subr.bf16.mxu0 %v8362_v52 }
 0x4a9   :  { %6596 = vmatpush3.bf16.msra.mxu0 %v8362_v52  ;;  %v9407_v52 = vand.u32 4294901760, %v8071_v38  ;;  %v9413_v38 = vand.u32 4294901760, %v8082_v45 }
 0x4aa   :  { %3515 = vrot.lane.b32.xlu1 %v680_v14, %s7215_s0  ;;  %3513 = vrot.lane.b32.xlu0 %v679_v30, %s7215_s0 }
 0x4ab   :  { %6598 = vmatprep.subr.bf16.mxu0 %v8366_v53  ;;  %v6641_v18 = vpack.c.bf16 %v9413_v38, %v9412_v60 }
 0x4ad   :  { %6600 = vmatpush3.bf16.msra.mxu0 %v8366_v53  ;;  %v6633_v53 = vpack.c.bf16 %v9407_v52, %v9406_v63 }
 0x4ae   :  { %3519 = vrot.lane.b32.xlu1 %v682_v5, %s7215_s0  ;;  %3517 = vrot.lane.b32.xlu0 %v681_v62, %s7215_s0  ;;  %s4877_s0 = sld [smem:[#allocation2 + $0x4]] }
 0x4af   :  { %6602 = vmatprep.subr.msk.bf16.mxu0 %vm9403_vm7, %v7217_v40 }
 0x4b0   :  { %5786 = vmatmul.mubr.f32.vlgmr.msra.gmra.mrb[4].mxu0 %v8392_v7  ;;  %v6645_v7 = vpack.c.bf16 %v9415_v11, %v9414_v54 }
 0x4b1   :  { %5788 = vmatprep.mubr.f32.mxu0 %v8429_v1  ;;  %6604 = vmatpush3.bf16.msk.msra.mxu0 %vm9403_vm7, %v7217_v40  ;;  %v9416_v1 = vand.u32 4294901760, %v8185_v17  ;;  %v9422_v17 = vand.u32 4294901760, %v8248_v43 }
 0x4b2   :  { %6606 = vmatprep.subr.msk.bf16.mxu0 %vm9404_vm11, %v7217_v40 }
 0x4b3   :  { %v6649_v45 = vpack.c.bf16 %v9417_v61, %v9416_v1  ;;  %v6661_v55 = vpack.c.bf16 %v9423_v3, %v9422_v17 }
 0x4b4   :  { %5789 = vmatmul.mubr.f32.gmra.mrb[6].mxu0 %v8442_v2  ;;  %v9419_v2 = vand.u32 4294901760, %v8205_v28 }
 0x4b5   :  { %6608 = vmatpush3.bf16.msk.msra.mxu0 %vm9404_vm11, %v7217_v40  ;;  %5823 = vmatprep.mubr.f32.mxu0 %v9405_v23 }
 0x4b6   :  { %6610 = vmatprep.subr.msk.bf16.mxu0 %vm8229_vm6, %v7217_v40 }
 0x4b9   :  { %6612 = vmatpush3.bf16.msk.msra.mxu0 %vm8229_vm6, %v7217_v40 }
 0x4ba   :  { %6614 = vmatprep.subr.msk.bf16.mxu0 %vm8261_vm13, %v7217_v40 }
 0x4bd   :  { %6616 = vmatpush3.bf16.msk.msra.mxu0 %vm8261_vm13, %v7217_v40 }
 0x4be   :  { %6618 = vmatprep.subr.msk.bf16.mxu0 %vm8285_vm12, %v7217_v40 }
 0x4c1   :  { %6620 = vmatpush3.bf16.msk.msra.mxu0 %vm8285_vm12, %v7217_v40 }
 0x4c2   :  { %6622 = vmatprep.subr.msk.bf16.mxu0 %vm8298_vm10, %v7217_v40 }
 0x4c5   :  { %6624 = vmatpush3.bf16.msk.msra.mxu0 %vm8298_vm10, %v7217_v40 }
 0x4c6   :  { %6626 = vmatprep.subr.msk.bf16.mxu0 %vm8320_vm8, %v7217_v40 }
 0x4c9   :  { %6628 = vmatpush3.bf16.msk.msra.mxu0 %vm8320_vm8, %v7217_v40 }
 0x4ca   :  { %6630 = vmatprep.subr.msk.bf16.mxu0 %vm8337_vm15, %v7217_v40 }
 0x4cd   :  { %6632 = vmatpush3.bf16.msk.msra.mxu0 %vm8337_vm15, %v7217_v40 }
 0x4ce   :  { %6634 = vmatprep.subr.bf16.mxu0 %v6633_v53 }
 0x4d0   :  { %5824 = vmatmul.mubr.f32.vlgmr.msra.gmra.mrb[4].mxu0 %v9410_v41 }
 0x4d1   :  { %5826 = vmatprep.mubr.f32.mxu0 %v9411_v15  ;;  %6636 = vmatpush3.bf16.msra.mxu0 %v6633_v53 }
 0x4d2   :  { %6638 = vmatprep.subr.bf16.mxu0 %v6637_v57 }
 0x4d4   :  { %5827 = vmatmul.mubr.f32.gmra.mrb[6].mxu0 %v2002_v27  ;;  %v9418_v27 = vand.u32 4294901760, %v8201_v26 }
 0x4d5   :  { %6640 = vmatpush3.bf16.msra.mxu0 %v6637_v57  ;;  %5861 = vmatprep.mubr.f32.mxu0 %v8386_v12 }
 0x4d6   :  { %6642 = vmatprep.subr.bf16.mxu0 %v6641_v18  ;;  %v6653_v56 = vpack.c.bf16 %v9419_v2, %v9418_v27 }
 0x4d9   :  { %6644 = vmatpush3.bf16.msra.mxu0 %v6641_v18 }
 0x4da   :  { %6646 = vmatprep.subr.bf16.mxu0 %v6645_v7 }
 0x4dd   :  { %6648 = vmatpush3.bf16.msra.mxu0 %v6645_v7 }
 0x4de   :  { %6650 = vmatprep.subr.bf16.mxu0 %v6649_v45 }
 0x4e1   :  { %6652 = vmatpush3.bf16.msra.mxu0 %v6649_v45 }
 0x4e2   :  { %6654 = vmatprep.subr.bf16.mxu0 %v6653_v56 }
 0x4e5   :  { %6656 = vmatpush3.bf16.msra.mxu0 %v6653_v56 }
 0x4e6   :  { %6658 = vmatprep.subr.bf16.mxu0 %v6657_v58 }
 0x4e9   :  { %6660 = vmatpush3.bf16.msra.mxu0 %v6657_v58 }
 0x4ea   :  { %6662 = vmatprep.subr.bf16.mxu0 %v6661_v55 }
 0x4ed   :  { %6664 = vmatpush3.bf16.msra.mxu0 %v6661_v55 }
 0x4ee   :  { %6666 = vmatprep.subr.msk.bf16.mxu0 %vm9403_vm7, %v7217_v40 }
 0x4f0   :  { %5862 = vmatmul.mubr.f32.vlgmr.msra.gmra.mrb[4].mxu0 %v8383_v10 }
 0x4f1   :  { %5864 = vmatprep.mubr.f32.mxu0 %v8409_v9  ;;  %6668 = vmatpush3.bf16.msk.msra.mxu0 %vm9403_vm7, %v7217_v40 }
 0x4f2   :  { %6670 = vmatprep.subr.msk.bf16.mxu0 %vm9404_vm11, %v7217_v40 }
 0x4f4   :  { %5865 = vmatmul.mubr.f32.gmra.mrb[6].mxu0 %v8432_v6 }
 0x4f5   :  { %6672 = vmatpush3.bf16.msk.msra.mxu0 %vm9404_vm11, %v7217_v40  ;;  %5899 = vmatprep.mubr.f32.mxu0 %v8386_v12 }
 0x4f6   :  { %6674 = vmatprep.subr.msk.bf16.mxu0 %vm8229_vm6, %v7217_v40 }
 0x4f7   :  { %v2690_v26 = vpop.permute.xlu1 %2689  ;;  %v2688_v28 = vpop.permute.xlu0 %2687 }
 0x4f8   :  { %v2739_v4 = vand.u32 4294901760, %v2690_v26  ;;  %v2736_v16 = vand.u32 4294901760, %v2688_v28 }
 0x4f9   :  { %6676 = vmatpush3.bf16.msk.msra.mxu0 %vm8229_vm6, %v7217_v40  ;;  %vm3521_vm6 = vcmask 64512  }
 0x4fa   :  { %v8612_v20 = vsub.f32 %v2690_v26, %v2739_v4  ;;  %v8614_v43 = vsub.f32 %v2688_v28, %v2736_v16  ;;  %6678 = vmatprep.subr.msk.bf16.mxu0 %vm8261_vm13, %v7217_v40  ;;  %v8681_v61 = vpack.c.bf16 %v2739_v4, %v2736_v16 }
 0x4fc   :  { %v2866_v48 = vand.u32 4294901760, %v8612_v20  ;;  %v2859_v24 = vand.u32 4294901760, %v8614_v43  ;;  %v8623_v12 = vpack.c.bf16 %v8612_v20, %v8614_v43 }
 0x4fd   :  { %6680 = vmatpush3.bf16.msk.msra.mxu0 %vm8261_vm13, %v7217_v40  ;;  %vm9428_vm13 = vcmask 261120  }
 0x4fe   :  { %6682 = vmatprep.subr.msk.bf16.mxu0 %vm8285_vm12, %v7217_v40  ;;  %v8635_v49 = vpack.c.bf16 %v2866_v48, %v2859_v24  ;;  %vm9429_vm2 = vmmov %vm9428_vm13 }
 0x4ff   :  { %vm9430_vm9 = vmmov %vm9429_vm2 }
 0x500   :  { %v2694_v34 = vpop.permute.xlu1 %2693  ;;  %v2692_v46 = vpop.permute.xlu0 %2691  ;;  %vm9432_vm14 = vmmov %vm9429_vm2 }
 0x501   :  { %6684 = vmatpush3.bf16.msk.msra.mxu0 %vm8285_vm12, %v7217_v40  ;;  %v2745_v59 = vand.u32 4294901760, %v2694_v34  ;;  %v2742_v8 = vand.u32 4294901760, %v2692_v46  ;;  %vm9431_vm12 = vmmov %vm9429_vm2 }
 0x502   :  { %6686 = vmatprep.subr.msk.bf16.mxu0 %vm8298_vm10, %v7217_v40  ;;  %vm9433_vm5 = vmmov %vm9429_vm2 }
 0x503   :  { %v2879_v50 = vsub.f32 %v2694_v34, %v2745_v59  ;;  %v2872_v31 = vsub.f32 %v2692_v46, %v2742_v8  ;;  %v8702_v46 = vpack.c.bf16 %v2745_v59, %v2742_v8  ;;  %vm9435_vm3 = vmmov %vm9429_vm2 }
 0x504   :  { %v8643_v47 = vpop.permute.xlu1 %2697  ;;  %v8645_v14 = vpop.permute.xlu0 %2695 }
 0x505   :  { %v2880_v30 = vand.u32 4294901760, %v2879_v50  ;;  %v2873_v5 = vand.u32 4294901760, %v2872_v31  ;;  %6688 = vmatpush3.bf16.msk.msra.mxu0 %vm8298_vm10, %v7217_v40  ;;  %v2751_v25 = vand.u32 4294901760, %v8643_v47  ;;  %v2748_v62 = vand.u32 4294901760, %v8645_v14  ;;  %vm9434_vm10 = vmmov %vm9429_vm2 }
 0x506   :  { %6690 = vmatprep.subr.msk.bf16.mxu0 %vm8320_vm8, %v7217_v40  ;;  %v8655_v23 = vpack.c.bf16 %v2879_v50, %v2872_v31 }
 0x507   :  { %v2881_v63 = vsub.f32 %v2879_v50, %v2880_v30  ;;  %v2874_v52 = vsub.f32 %v2872_v31, %v2873_v5  ;;  %v2893_v53 = vsub.f32 %v8643_v47, %v2751_v25  ;;  %v2886_v51 = vsub.f32 %v8645_v14, %v2748_v62 }
 0x508   :  { %v8659_v42 = vpop.permute.xlu1 %2701  ;;  %v8661_v0 = vpop.permute.xlu0 %2699  ;;  %v8663_v57 = vpack.c.bf16 %v2880_v30, %v2873_v5 }
 0x509   :  { %v2894_v41 = vand.u32 4294901760, %v2893_v53  ;;  %6692 = vmatpush3.bf16.msk.msra.mxu0 %vm8320_vm8, %v7217_v40  ;;  %v2757_v15 = vand.u32 4294901760, %v8659_v42  ;;  %v2754_v60 = vand.u32 4294901760, %v8661_v0  ;;  %v2875_v38 = vand.u32 4294901760, %v2874_v52 }
 0x50a   :  { %v2887_v18 = vand.u32 4294901760, %v2886_v51  ;;  %6694 = vmatprep.subr.msk.bf16.mxu0 %vm8337_vm15, %v7217_v40  ;;  %v2882_v54 = vand.u32 4294901760, %v2881_v63  ;;  %v8673_v11 = vpack.c.bf16 %v2893_v53, %v2886_v51 }
 0x50b   :  { %v2895_v7 = vsub.f32 %v2893_v53, %v2894_v41  ;;  %v2907_v1 = vsub.f32 %v8659_v42, %v2757_v15  ;;  %v2900_v29 = vsub.f32 %v8661_v0, %v2754_v60 }
 0x50c   :  { %v2888_v45 = vsub.f32 %v2886_v51, %v2887_v18  ;;  %v8683_v27 = vpop.permute.xlu1 %2705  ;;  %v8685_v2 = vpop.permute.xlu0 %2703  ;;  %v8687_v56 = vpack.c.bf16 %v2882_v54, %v2875_v38  ;;  %v8689_v32 = vpack.c.bf16 %v2894_v41, %v2887_v18  ;;  %v8729_v51 = vpack.c.bf16 %v2751_v25, %v2748_v62 }
 0x50d   :  { %v2908_v39 = vand.u32 4294901760, %v2907_v1  ;;  %v2901_v58 = vand.u32 4294901760, %v2900_v29  ;;  %6696 = vmatpush3.bf16.msk.msra.mxu0 %vm8337_vm15, %v7217_v40  ;;  %v2763_v17 = vand.u32 4294901760, %v8683_v27  ;;  %v2760_v3 = vand.u32 4294901760, %v8685_v2 }
 0x50e   :  { %6698 = vmatprep.subr.bf16.mxu0 %v8681_v61  ;;  %v2889_v55 = vand.u32 4294901760, %v2888_v45  ;;  %v2896_v26 = vand.u32 4294901760, %v2895_v7  ;;  %v8697_v28 = vpack.c.bf16 %v2907_v1, %v2900_v29 }
 0x50f   :  { %v2909_v4 = vsub.f32 %v2907_v1, %v2908_v39  ;;  %v2902_v16 = vsub.f32 %v2900_v29, %v2901_v58  ;;  %v2921_v34 = vsub.f32 %v8683_v27, %v2763_v17  ;;  %v2914_v40 = vsub.f32 %v8685_v2, %v2760_v3 }
 0x510   :  { %5900 = vmatmul.mubr.f32.vlgmr.msra.gmra.mrb[4].mxu0 %v8383_v10  ;;  %v8708_v19 = vpop.permute.xlu1 %2709  ;;  %v8710_v50 = vpop.permute.xlu0 %2707  ;;  %v8712_v31 = vpack.c.bf16 %v2896_v26, %v2889_v55  ;;  %v8714_v47 = vpack.c.bf16 %v2908_v39, %v2901_v58 }
 0x511   :  { %v2922_v14 = vand.u32 4294901760, %v2921_v34  ;;  %5902 = vmatprep.mubr.f32.mxu0 %v8409_v9  ;;  %6700 = vmatpush3.bf16.msra.mxu0 %v8681_v61  ;;  %v2769_v59 = vand.u32 4294901760, %v8708_v19  ;;  %v2766_v8 = vand.u32 4294901760, %v8710_v50  ;;  %v2903_v30 = vand.u32 4294901760, %v2902_v16 }
 0x512   :  { %v2915_v5 = vand.u32 4294901760, %v2914_v40  ;;  %6702 = vmatprep.subr.bf16.mxu0 %v8702_v46  ;;  %v2910_v10 = vand.u32 4294901760, %v2909_v4  ;;  %v8721_v63 = vpack.c.bf16 %v2921_v34, %v2914_v40  ;;  %v8753_v4 = vpack.c.bf16 %v2757_v15, %v2754_v60 }
 0x513   :  { %v2923_v52 = vsub.f32 %v2921_v34, %v2922_v14  ;;  %v2935_v53 = vsub.f32 %v8708_v19, %v2769_v59  ;;  %v2928_v9 = vsub.f32 %v8710_v50, %v2766_v8 }
 0x514   :  { %v2916_v41 = vsub.f32 %v2914_v40, %v2915_v5  ;;  %5903 = vmatmul.mubr.f32.gmra.mrb[6].mxu0 %v8432_v6  ;;  %v8732_v38 = vpop.permute.xlu1 %2713  ;;  %v8734_v18 = vpop.permute.xlu0 %2711  ;;  %v8736_v54 = vpack.c.bf16 %v2910_v10, %v2903_v30  ;;  %v8738_v7 = vpack.c.bf16 %v2922_v14, %v2915_v5 }
 0x515   :  { %v2936_v1 = vand.u32 4294901760, %v2935_v53  ;;  %v2929_v29 = vand.u32 4294901760, %v2928_v9  ;;  %v9217_v45 = vand.u32 4294901760, %v8732_v38  ;;  %6704 = vmatpush3.bf16.msra.mxu0 %v8702_v46  ;;  %v9220_v25 = vand.u32 4294901760, %v8734_v18 }
 0x516   :  { %6706 = vmatprep.subr.bf16.mxu0 %v8729_v51  ;;  %v2917_v62 = vand.u32 4294901760, %v2916_v41  ;;  %v2924_v6 = vand.u32 4294901760, %v2923_v52  ;;  %v8744_v39 = vpack.c.bf16 %v2935_v53, %v2928_v9 }
 0x517   :  { %v2937_v58 = vsub.f32 %v2935_v53, %v2936_v1  ;;  %v2930_v55 = vsub.f32 %v2928_v9, %v2929_v29  ;;  %v2949_v26 = vsub.f32 %v8732_v38, %v9217_v45  ;;  %v2942_v16 = vsub.f32 %v8734_v18, %v9220_v25 }
 0x518   :  { %v8758_v34 = vpop.permute.xlu1 %2717  ;;  %v8760_v40 = vpop.permute.xlu0 %2715  ;;  %v8762_v14 = vpack.c.bf16 %v2924_v6, %v2917_v62  ;;  %v8764_v30 = vpack.c.bf16 %v2936_v1, %v2929_v29  ;;  %v8782_v1 = vpack.c.bf16 %v2763_v17, %v2760_v3 }
 0x519   :  { %v2950_v5 = vand.u32 4294901760, %v2949_v26  ;;  %v9218_v10 = vand.u32 4294901760, %v8758_v34  ;;  %6708 = vmatpush3.bf16.msra.mxu0 %v8729_v51  ;;  %v9219_v42 = vand.u32 4294901760, %v8760_v40  ;;  %v2931_v0 = vand.u32 4294901760, %v2930_v55 }
 0x51a   :  { %v2943_v15 = vand.u32 4294901760, %v2942_v16  ;;  %6710 = vmatprep.subr.bf16.mxu0 %v8753_v4  ;;  %v2938_v60 = vand.u32 4294901760, %v2937_v58  ;;  %v8770_v52 = vpack.c.bf16 %v2949_v26, %v2942_v16 }
 0x51b   :  { %v2951_v53 = vsub.f32 %v2949_v26, %v2950_v5  ;;  %v2963_v9 = vsub.f32 %v8758_v34, %v9218_v10  ;;  %v2956_v41 = vsub.f32 %v8760_v40, %v9219_v42 }
 0x51c   :  { %v2944_v29 = vsub.f32 %v2942_v16, %v2943_v15  ;;  %v3516_v62 = vpop.permute.xlu1 %3515  ;;  %v3514_v6 = vpop.permute.xlu0 %3513  ;;  %v8784_v58 = vpack.c.bf16 %v2938_v60, %v2931_v0  ;;  %v8786_v55 = vpack.c.bf16 %v2950_v5, %v2943_v15  ;;  %v8804_v60 = vpack.c.bf16 %v2769_v59, %v2766_v8 }
 0x51d   :  { %v2964_v26 = vand.u32 4294901760, %v2963_v9  ;;  %v2957_v45 = vand.u32 4294901760, %v2956_v41  ;;  %v3524_v10 = vsel %vm3521_vm6, %v3516_v62, 0  ;;  %6712 = vmatpush3.bf16.msra.mxu0 %v8753_v4  ;;  %v3522_v42 = vsel %vm3521_vm6, %v3514_v6, 0 }
 0x51e   :  { %v8791_v2 = vand.u32 4294901760, %v3524_v10  ;;  %v8793_v27 = vand.u32 4294901760, %v3522_v42  ;;  %6714 = vmatprep.subr.bf16.mxu0 %v8782_v1  ;;  %v2945_v17 = vand.u32 4294901760, %v2944_v29  ;;  %v2952_v3 = vand.u32 4294901760, %v2951_v53 }
 0x51f   :  { %v2965_v16 = vsub.f32 %v2963_v9, %v2964_v26  ;;  %v2958_v0 = vsub.f32 %v2956_v41, %v2957_v45  ;;  %v8796_v5 = vpack.c.bf16 %v2963_v9, %v2956_v41  ;;  %v8798_v15 = vpack.c.bf16 %v2964_v26, %v2957_v45 }
 0x520   :  { %v3607_v62 = vsub.f32 %v3524_v10, %v8791_v2  ;;  %v3597_v6 = vsub.f32 %v3522_v42, %v8793_v27  ;;  %v3520_v25 = vpop.permute.xlu1 %3519  ;;  %6143 = vmatprep.mubr.f32.mxu1 %v8793_v27  ;;  %v3518_v53 = vpop.permute.xlu0 %3517  ;;  %v8809_v29 = vpack.c.bf16 %v2952_v3, %v2945_v17  ;;  %v2860_v41 = vsub.f32 %v8614_v43, %v2859_v24 }
 0x521   :  { %v3528_v9 = vsel %vm3521_vm6, %v3520_v25, 0  ;;  %6716 = vmatpush3.bf16.msra.mxu0 %v8782_v1  ;;  %v3526_v50 = vsel %vm3521_vm6, %v3518_v53, 0  ;;  %6144 = vmatmul.mubr.f32.vlgmr.msra.gmra.mrb[8].mxu1 %v8791_v2  ;;  %v2959_v19 = vand.u32 4294901760, %v2958_v0  ;;  %v2966_v59 = vand.u32 4294901760, %v2965_v16 }
 0x522   :  { %v3608_v8 = vand.u32 4294901760, %v3607_v62  ;;  %v3626_v45 = vand.u32 4294901760, %v3528_v9  ;;  %v3616_v10 = vand.u32 4294901760, %v3526_v50  ;;  %6718 = vmatprep.subr.bf16.mxu0 %v8804_v60  ;;  %6150 = vmatpush3.msra.mxu1 %v8459_v22  ;;  %v3598_v42 = vand.u32 4294901760, %v3597_v6 }
 0x523   :  { %v2867_v25 = vsub.f32 %v8612_v20, %v2866_v48  ;;  %v9424_v26 = vand.u32 4294901760, %v8734_v18  ;;  %v9425_v17 = vand.u32 4294901760, %v8732_v38  ;;  %6157 = vmatprep.subr.mxu1 %v8452_v35  ;;  %v8830_v16 = vpack.c.bf16 %v2966_v59, %v2959_v19 }
 0x524   :  { %v8832_v22 = vsub.f32 %v3607_v62, %v3608_v8  ;;  %v3627_v0 = vsub.f32 %v3528_v9, %v3626_v45  ;;  %v3617_v53 = vsub.f32 %v3526_v50, %v3616_v10  ;;  %6146 = vmatprep.mubr.f32.mxu1 %v3616_v10  ;;  %v8834_v20 = vsub.f32 %v3597_v6, %v3598_v42 }
 0x525   :  { %v8827_v3 = vpack.c.bf16 %v9425_v17, %v9424_v26  ;;  %6720 = vmatpush3.bf16.msra.mxu0 %v8804_v60  ;;  %6147 = vmatmul.mubr.f32.gmra.mrb[10].mxu1 %v3626_v45  ;;  %v2861_v24 = vand.u32 4294901760, %v2860_v41  ;;  %v9426_v38 = vand.u32 4294901760, %v8760_v40  ;;  %v9427_v18 = vand.u32 4294901760, %v8758_v34 }
 0x526   :  { %6151 = vmatprep.mubr.f32.mxu1 %v3597_v6  ;;  %v3618_v43 = vand.u32 4294901760, %v3617_v53  ;;  %v3628_v48 = vand.u32 4294901760, %v3627_v0  ;;  %v2868_v9 = vand.u32 4294901760, %v2867_v25 }
 0x527   :  { %6722 = vmatprep.subr.bf16.mxu0 %v8827_v3  ;;  %v8842_v19 = vpack.c.bf16 %v9427_v18, %v9426_v38 }
 0x528   :  { %v8844_v50 = vsub.f32 %v3617_v53, %v3618_v43  ;;  %v8846_v59 = vsub.f32 %v3627_v0, %v3628_v48  ;;  %v8851_v6 = vpack.c.bf16 %v2868_v9, %v2861_v24 }
 0x529   :  { %6724 = vmatpush3.bf16.msra.mxu0 %v8827_v3  ;;  %6152 = vmatmul.mubr.f32.vlgmr.msra.gmra.mrb[8].mxu1 %v3607_v62 }
 0x52a   :  { %6726 = vmatprep.subr.bf16.mxu0 %v8842_v19  ;;  %6154 = vmatprep.mubr.f32.mxu1 %v3617_v53 }
 0x52b   :  { %6158 = vmatpush3.msra.mxu1 %v8452_v35 }
 0x52c   :  { %6165 = vmatprep.subr.mxu1 %v8467_v37 }
 0x52d   :  { %6728 = vmatpush3.bf16.msra.mxu0 %v8842_v19  ;;  %6155 = vmatmul.mubr.f32.gmra.mrb[10].mxu1 %v3627_v0 }
 0x52e   :  { %6730 = vmatprep.subr.bf16.mxu0 %v8851_v6  ;;  %6159 = vmatprep.mubr.f32.mxu1 %v3598_v42 }
 0x531   :  { %6160 = vmatmul.mubr.f32.vlgmr.msra.gmra.mrb[8].mxu1 %v3608_v8 }
 0x532   :  { %6162 = vmatprep.mubr.f32.mxu1 %v3618_v43  ;;  %6166 = vmatpush3.msra.mxu1 %v8467_v37 }
 0x533   :  { %6173 = vmatprep.subr.mxu1 %v8452_v35 }
 0x535   :  { %6163 = vmatmul.mubr.f32.gmra.mrb[10].mxu1 %v3628_v48 }
 0x536   :  { %6167 = vmatprep.mubr.f32.mxu1 %v8793_v27 }
 0x539   :  { %6168 = vmatmul.mubr.f32.vlgmr.msra.gmra.mrb[8].mxu1 %v8791_v2 }
 0x53a   :  { %6170 = vmatprep.mubr.f32.mxu1 %v3616_v10  ;;  %6174 = vmatpush3.msra.mxu1 %v8452_v35 }
 0x53d   :  { %6171 = vmatmul.mubr.f32.gmra.mrb[10].mxu1 %v3626_v45 }
 0x53e   :  { %6175 = vmatprep.mubr.f32.mxu1 %v8793_v27 }
 0x541   :  { %6176 = vmatmul.mubr.f32.vlgmr.msra.gmra.mrb[8].mxu1 %v8791_v2 }
 0x542   :  { %6178 = vmatprep.mubr.f32.mxu1 %v3616_v10 }
 0x545   :  { %6179 = vmatmul.mubr.f32.gmra.mrb[10].mxu1 %v3626_v45 }
 0x56b   :  { %v5711_v34 = vpop.f32.mrb[4].mxu1 }
 0x56c   :  { %v1976_v40 = vpop.f32.mrb[5].mxu1 }
 0x572   :  { %v5714_v37 = vpop.f32.mrb[6].mxu1 }
 0x573   :  { %v1996_v62 = vpop.f32.mrb[7].mxu1 }
 0x5e3   :  { %v5901_v8 = vpop.f32.mrb[4].mxu0 }
 0x5e4   :  { %v6941_v42 = vadd.f32 %v5901_v8, %v5711_v34  ;;  %v2637_v25 = vpop.f32.mrb[5].mxu0 }
 0x5e5   :  { %v6942_v41 = vadd.f32 %v2637_v25, %v1976_v40 }
 0x5e6   :  { %7167 = vrcp.f32 %v6941_v42 }
 0x5e7   :  { %7169 = vrcp.f32 %v6942_v41  ;;  %v5904_v26 = vpop.f32.mrb[6].mxu0 }
 0x5e8   :  { %v6943_v17 = vadd.f32 %v5904_v26, %v5714_v37  ;;  %v2649_v0 = vpop.f32.mrb[7].mxu0 }
 0x5e9   :  { %v6944_v53 = vadd.f32 %v2649_v0, %v1996_v62 }
 0x5ea   :  { %7171 = vrcp.f32 %v6943_v17 }
 0x5eb   :  { %7173 = vrcp.f32 %v6944_v53 }
 0x5f0   :  { %v7168_v27 = vpop.eup %7167 }
 0x5f1   :  { %v7170_v2 = vpop.eup %7169  ;;  %v2664_v45 = vmul.f32 %v7168_v27, %v8376_v13 }
 0x5f2   :  { %v2663_v10 = vmul.f32 %v7170_v2, %v8378_v36 }
 0x5f3   :  { %2668 = vst [vmem:[%s9128_s5 + $0x8] sm:$0xff] %v2664_v45  ;;  %v8868_v43 = vand.u32 4294901760, %v2664_v45 }
 0x5f4   :  { %v7172_v48 = vpop.eup %7171  ;;  %2667 = vst [vmem:[%s9128_s5] sm:$0xff] %v2663_v10  ;;  %v8873_v24 = vand.u32 4294901760, %v2663_v10 }
 0x5f5   :  { %v7174_v38 = vpop.eup %7173  ;;  %v8876_v18 = vsub.f32 %v2664_v45, %v8868_v43  ;;  %v2666_v13 = vmul.f32 %v7172_v48, %v8424_v44 }
 0x5f6   :  { %v2665_v36 = vmul.f32 %v7174_v38, %v8401_v33  ;;  %v8881_v9 = vsub.f32 %v2663_v10, %v8873_v24  ;;  %v3507_v38 = vsub.s32 1, %v9348_v21 }
 0x5f7   :  { %2670 = vst [vmem:[%s9128_s5 + $0x18] sm:$0xff] %v2666_v13  ;;  %v8886_v34 = vand.u32 4294901760, %v2666_v13  ;;  %v2828_v40 = vand.u32 4294901760, %v8876_v18 }
 0x5f8   :  { %2669 = vst [vmem:[%s9128_s5 + $0x10] sm:$0xff] %v2665_v36  ;;  %v8892_v37 = vand.u32 4294901760, %v2665_v36  ;;  %v2818_v44 = vand.u32 4294901760, %v8881_v9 }
 0x5f9   :  { %v2829_v33 = vsub.f32 %v8876_v18, %v2828_v40  ;;  %v8899_v62 = vsub.f32 %v2666_v13, %v8886_v34 }
 0x5fa   :  { %v2819_v8 = vsub.f32 %v8881_v9, %v2818_v44  ;;  %v8905_v42 = vsub.f32 %v2665_v36, %v8892_v37 }
 0x5fb   :  { %v2848_v25 = vand.u32 4294901760, %v8899_v62  ;;  %v2830_v17 = vand.u32 4294901760, %v2829_v33  ;;  %v4125_v33 = vstv %s4112_s16 }
 0x5fc   :  { %v2820_v41 = vand.u32 4294901760, %v2819_v8  ;;  %v2838_v26 = vand.u32 4294901760, %v8905_v42 }
 0x5fd   :  { %v2849_v0 = vsub.f32 %v8899_v62, %v2848_v25 }
 0x5fe   :  { %5937 = vmatprep.mubr.f32.mxu0 %v2820_v41  ;;  %v2839_v53 = vsub.f32 %v8905_v42, %v2838_v26 }
 0x5ff   :  { %5938 = vmatmul.mubr.f32.vlgmr.msra.gmra.mrb[8].mxu0 %v2830_v17  ;;  %v2850_v2 = vand.u32 4294901760, %v2849_v0 }
 0x600   :  { %6732 = vmatpush3.bf16.msra.mxu0 %v8851_v6  ;;  %v2840_v27 = vand.u32 4294901760, %v2839_v53 }
 0x601   :  { %6734 = vmatprep.subr.bf16.mxu0 %v8687_v56 }
 0x602   :  { %5940 = vmatprep.mubr.f32.mxu0 %v2840_v27 }
 0x603   :  { %5941 = vmatmul.mubr.f32.gmra.mrb[10].mxu0 %v2850_v2 }
 0x604   :  { %6736 = vmatpush3.bf16.msra.mxu0 %v8687_v56  ;;  %5975 = vmatprep.mubr.f32.mxu0 %v8873_v24 }
 0x605   :  { %6738 = vmatprep.subr.bf16.mxu0 %v8712_v31 }
 0x608   :  { %6740 = vmatpush3.bf16.msra.mxu0 %v8712_v31 }
 0x609   :  { %6742 = vmatprep.subr.bf16.mxu0 %v8736_v54 }
 0x60c   :  { %6744 = vmatpush3.bf16.msra.mxu0 %v8736_v54 }
 0x60d   :  { %6746 = vmatprep.subr.bf16.mxu0 %v8762_v14 }
 0x610   :  { %6748 = vmatpush3.bf16.msra.mxu0 %v8762_v14 }
 0x611   :  { %6750 = vmatprep.subr.bf16.mxu0 %v8784_v58 }
 0x614   :  { %6752 = vmatpush3.bf16.msra.mxu0 %v8784_v58  ;;  %v8927_v6 = vpop.f32.mrb[8].mxu1 }
 0x615   :  { %6754 = vmatprep.subr.bf16.mxu0 %v8809_v29  ;;  %v8930_v56 = vpop.f32.mrb[9].mxu1 }
 0x618   :  { %6756 = vmatpush3.bf16.msra.mxu0 %v8809_v29  ;;  %v8933_v31 = vpop.f32.mrb[10].mxu1 }
 0x619   :  { %6758 = vmatprep.subr.bf16.mxu0 %v8830_v16  ;;  %v8936_v54 = vpop.f32.mrb[11].mxu1 }
 0x61c   :  { %6760 = vmatpush3.bf16.msra.mxu0 %v8830_v16 }
 0x61d   :  { %6762 = vmatprep.subr.bf16.mxu0 %v8623_v12 }
 0x61f   :  { %5976 = vmatmul.mubr.f32.vlgmr.msra.gmra.mrb[8].mxu0 %v8868_v43 }
 0x620   :  { %5978 = vmatprep.mubr.f32.mxu0 %v8892_v37  ;;  %6764 = vmatpush3.bf16.msra.mxu0 %v8623_v12  ;;  %v3600_v12 = vand.u32 4294901760, %v8834_v20 }
 0x621   :  { %6766 = vmatprep.subr.bf16.mxu0 %v8655_v23 }
 0x623   :  { %5979 = vmatmul.mubr.f32.gmra.mrb[10].mxu0 %v8886_v34 }
 0x624   :  { %6768 = vmatpush3.bf16.msra.mxu0 %v8655_v23  ;;  %6013 = vmatprep.mubr.f32.mxu0 %v8881_v9  ;;  %v3620_v23 = vand.u32 4294901760, %v8844_v50 }
 0x625   :  { %6770 = vmatprep.subr.bf16.mxu0 %v8673_v11 }
 0x628   :  { %6772 = vmatpush3.bf16.msra.mxu0 %v8673_v11  ;;  %v42_v11 = vld [vmem:[%s9125_s2] sm:$0xff] }
 0x629   :  { %6774 = vmatprep.subr.bf16.mxu0 %v8697_v28 }
 0x62c   :  { %6776 = vmatpush3.bf16.msra.mxu0 %v8697_v28 }
 0x62d   :  { %6778 = vmatprep.subr.bf16.mxu0 %v8721_v63 }
 0x630   :  { %6780 = vmatpush3.bf16.msra.mxu0 %v8721_v63  ;;  %v44_v63 = vld [vmem:[%s9125_s2 + $0x10] sm:$0xff] }
 0x631   :  { %6782 = vmatprep.subr.bf16.mxu0 %v8744_v39 }
 0x634   :  { %6784 = vmatpush3.bf16.msra.mxu0 %v8744_v39 }
 0x635   :  { %6786 = vmatprep.subr.bf16.mxu0 %v8770_v52 }
 0x638   :  { %6788 = vmatpush3.bf16.msra.mxu0 %v8770_v52 }
 0x639   :  { %6790 = vmatprep.subr.bf16.mxu0 %v8796_v5 }
 0x63c   :  { %6792 = vmatpush3.bf16.msra.mxu0 %v8796_v5 }
 0x63d   :  { %6794 = vmatprep.subr.bf16.mxu0 %v8681_v61 }
 0x63f   :  { %6014 = vmatmul.mubr.f32.vlgmr.msra.gmra.mrb[8].mxu0 %v8876_v18  ;;  %v9069_v18 = vld [vmem:[%s9125_s2 + $0x28] sm:$0x3] }
 0x640   :  { %6016 = vmatprep.mubr.f32.mxu0 %v8905_v42  ;;  %6796 = vmatpush3.bf16.msra.mxu0 %v8681_v61  ;;  %v3508_v9 = vrot.slane %v9069_v18, %v3507_v38 }
 0x641   :  { %6798 = vmatprep.subr.bf16.mxu0 %v8702_v46 }
 0x643   :  { %6017 = vmatmul.mubr.f32.gmra.mrb[10].mxu0 %v8899_v62 }
 0x644   :  { %6800 = vmatpush3.bf16.msra.mxu0 %v8702_v46  ;;  %6051 = vmatprep.mubr.f32.mxu0 %v2818_v44 }
 0x645   :  { %6802 = vmatprep.subr.bf16.mxu0 %v8729_v51 }
 0x648   :  { %6804 = vmatpush3.bf16.msra.mxu0 %v8729_v51 }
 0x649   :  { %6806 = vmatprep.subr.bf16.mxu0 %v8753_v4 }
 0x64c   :  { %6808 = vmatpush3.bf16.msra.mxu0 %v8753_v4 }
 0x64d   :  { %6810 = vmatprep.subr.bf16.mxu0 %v8782_v1 }
 0x650   :  { %6812 = vmatpush3.bf16.msra.mxu0 %v8782_v1 }
 0x651   :  { %6814 = vmatprep.subr.bf16.mxu0 %v8804_v60 }
 0x654   :  { %6816 = vmatpush3.bf16.msra.mxu0 %v8804_v60 }
 0x655   :  { %6818 = vmatprep.subr.bf16.mxu0 %v8827_v3 }
 0x658   :  { %6820 = vmatpush3.bf16.msra.mxu0 %v8827_v3 }
 0x659   :  { %6822 = vmatprep.subr.bf16.mxu0 %v8842_v19 }
 0x65c   :  { %6824 = vmatpush3.bf16.msra.mxu0 %v8842_v19 }
 0x65d   :  { %6826 = vmatprep.subr.bf16.mxu0 %v8635_v49 }
 0x65f   :  { %6052 = vmatmul.mubr.f32.vlgmr.msra.gmra.mrb[8].mxu0 %v2828_v40 }
 0x660   :  { %6054 = vmatprep.mubr.f32.mxu0 %v2838_v26  ;;  %6828 = vmatpush3.bf16.msra.mxu0 %v8635_v49  ;;  %v3610_v49 = vand.u32 4294901760, %v8832_v22 }
 0x661   :  { %6830 = vmatprep.subr.bf16.mxu0 %v8663_v57 }
 0x663   :  { %6055 = vmatmul.mubr.f32.gmra.mrb[10].mxu0 %v2848_v25  ;;  %v4120_v25 = vstv %s4878_s15 }
 0x664   :  { %6832 = vmatpush3.bf16.msra.mxu0 %v8663_v57  ;;  %6089 = vmatprep.mubr.f32.mxu0 %v8873_v24  ;;  %v3630_v57 = vand.u32 4294901760, %v8846_v59 }
 0x665   :  { %6834 = vmatprep.subr.bf16.mxu0 %v8689_v32 }
 0x668   :  { %6836 = vmatpush3.bf16.msra.mxu0 %v8689_v32 }
 0x669   :  { %6838 = vmatprep.subr.bf16.mxu0 %v8714_v47 }
 0x66c   :  { %6840 = vmatpush3.bf16.msra.mxu0 %v8714_v47 }
 0x66d   :  { %6842 = vmatprep.subr.bf16.mxu0 %v8738_v7 }
 0x670   :  { %6844 = vmatpush3.bf16.msra.mxu0 %v8738_v7  ;;  %v4161_v7 = vand.u32 4294901760, %v44_v63 }
 0x671   :  { %6846 = vmatprep.subr.bf16.mxu0 %v8764_v30 }
 0x672   :  { %v4279_v58 = vsub.f32 %v44_v63, %v4161_v7 }
 0x674   :  { %6848 = vmatpush3.bf16.msra.mxu0 %v8764_v30 }
 0x675   :  { %6850 = vmatprep.subr.bf16.mxu0 %v8786_v55 }
 0x678   :  { %6852 = vmatpush3.bf16.msra.mxu0 %v8786_v55 }
 0x679   :  { %6854 = vmatprep.subr.bf16.mxu0 %v8798_v15 }
 0x67c   :  { %6856 = vmatpush3.bf16.msra.mxu0 %v8798_v15 }
 0x67d   :  { %6858 = vmatprep.subr.bf16.mxu0 %v8681_v61 }
 0x67f   :  { %6090 = vmatmul.mubr.f32.vlgmr.msra.gmra.mrb[8].mxu0 %v8868_v43 }
 0x680   :  { %6092 = vmatprep.mubr.f32.mxu0 %v8892_v37  ;;  %6860 = vmatpush3.bf16.msra.mxu0 %v8681_v61  ;;  %v4155_v61 = vand.u32 4294901760, %v42_v11 }
 0x681   :  { %6862 = vmatprep.subr.bf16.mxu0 %v8702_v46 }
 0x683   :  { %6093 = vmatmul.mubr.f32.gmra.mrb[10].mxu0 %v8886_v34 }
 0x684   :  { %6864 = vmatpush3.bf16.msra.mxu0 %v8702_v46  ;;  %6127 = vmatprep.mubr.f32.mxu0 %v8873_v24  ;;  %v4265_v46 = vsub.f32 %v42_v11, %v4155_v61 }
 0x685   :  { %6866 = vmatprep.subr.bf16.mxu0 %v8729_v51 }
 0x688   :  { %6868 = vmatpush3.bf16.msra.mxu0 %v8729_v51  ;;  %v45_v51 = vld [vmem:[%s9125_s2 + $0x18] sm:$0xff] }
 0x689   :  { %6870 = vmatprep.subr.bf16.mxu0 %v8753_v4  ;;  %v4164_v39 = vand.u32 4294901760, %v45_v51 }
 0x68b   :  { %v9048_v30 = vpack.c.bf16 %v4164_v39, %v4161_v7  ;;  %v4286_v55 = vsub.f32 %v45_v51, %v4164_v39 }
 0x68c   :  { %6872 = vmatpush3.bf16.msra.mxu0 %v8753_v4  ;;  %v4266_v4 = vand.u32 4294901760, %v4265_v46 }
 0x68d   :  { %6874 = vmatprep.subr.bf16.mxu0 %v8782_v1  ;;  %v4287_v29 = vand.u32 4294901760, %v4286_v55  ;;  %v9059_v45 = vpack.c.bf16 %v4286_v55, %v4279_v58 }
 0x68e   :  { %v4267_v52 = vsub.f32 %v4265_v46, %v4266_v4 }
 0x68f   :  { %v4288_v22 = vsub.f32 %v4286_v55, %v4287_v29 }
 0x690   :  { %6876 = vmatpush3.bf16.msra.mxu0 %v8782_v1  ;;  %v4268_v5 = vand.u32 4294901760, %v4267_v52 }
 0x691   :  { %6878 = vmatprep.subr.bf16.mxu0 %v8804_v60 }
 0x694   :  { %6880 = vmatpush3.bf16.msra.mxu0 %v8804_v60  ;;  %v4280_v60 = vand.u32 4294901760, %v4279_v58 }
 0x695   :  { %6882 = vmatprep.subr.bf16.mxu0 %v8827_v3 }
 0x696   :  { %v4281_v16 = vsub.f32 %v4279_v58, %v4280_v60 }
 0x698   :  { %6884 = vmatpush3.bf16.msra.mxu0 %v8827_v3  ;;  %v4282_v20 = vand.u32 4294901760, %v4281_v16 }
 0x699   :  { %6886 = vmatprep.subr.bf16.mxu0 %v8842_v19 }
 0x69c   :  { %6888 = vmatpush3.bf16.msra.mxu0 %v8842_v19  ;;  %v4289_v19 = vand.u32 4294901760, %v4288_v22 }
 0x69d   :  { %6133 = vmatprep.subr.mxu0 %v8452_v35 }
 0x69e   :  { %v9055_v50 = vpack.c.bf16 %v4289_v19, %v4282_v20 }
 0x69f   :  { %6128 = vmatmul.mubr.f32.vlgmr.msra.gmra.mrb[8].mxu0 %v8868_v43  ;;  %v9063_v43 = vpack.c.bf16 %v4287_v29, %v4280_v60 }
 0x6a0   :  { %6130 = vmatprep.mubr.f32.mxu0 %v8892_v37  ;;  %6134 = vmatpush3.msra.mxu0 %v8452_v35  ;;  %v43_v35 = vld [vmem:[%s9125_s2 + $0x8] sm:$0xff]  ;;  %s7220_s2 = smov [#allocation5]  }
 0x6a1   :  { %v4158_v32 = vand.u32 4294901760, %v43_v35  ;;  %s4777_s17 = sshll.u32 %s7220_s2, 4  ;;  %s4778_s17 = int_to_ptr.vmem [resolvable:$true] %s4777_s17 }
 0x6a2   :  { %s7187_s18 = scalar_lea.vmem %s4778_s17, 512  ;;  %p7192_p6 = scmp.lt.s32.totalorder %s4778_s17, %s4778_s17 }
 0x6a3   :  { %6131 = vmatmul.mubr.f32.gmra.mrb[10].mxu0 %v8886_v34  ;;  %v9038_v28 = vpack.c.bf16 %v4158_v32, %v4155_v61  ;;  %v4272_v47 = vsub.f32 %v43_v35, %v4158_v32  ;;  %v4114_v34 = vstv %s4877_s0  ;;  %p7188_p5 = scmp.ne.s32.totalorder %s4778_s17, %s7187_s18  ;;  %p7193_p7 = scmp.lt.s32.totalorder %s7187_s18, %s7187_s18 }
 0x6a4   :  { %6135 = vmatprep.mubr.f32.mxu0 %v3600_v12 }
 0x6a5   :  { %6890 = vmatprep.subr.bf16.mxu0 %v9038_v28  ;;  %v4273_v14 = vand.u32 4294901760, %v4272_v47  ;;  %v9057_v59 = vpack.c.bf16 %v4272_v47, %v4265_v46  ;;  %p7194_p8 = por %p7193_p7, %p7192_p6 }
 0x6a7   :  { %6136 = vmatmul.mubr.f32.vlgmr.msra.gmra.mrb[12].mxu0 %v3610_v49  ;;  %v4274_v1 = vsub.f32 %v4272_v47, %v4273_v14  ;;  %v9061_v10 = vpack.c.bf16 %v4273_v14, %v4266_v4  ;;  %p7195_p9 = pnand %p7194_p8, %p7188_p5 }
 0x6a8   :  { %6138 = vmatprep.mubr.f32.mxu0 %v3620_v23  ;;  %6892 = vmatpush3.bf16.msra.mxu0 %v9038_v28 }
 0x6a9   :  { %6894 = vmatprep.subr.bf16.mxu0 %v9048_v30  ;;  %v4275_v15 = vand.u32 4294901760, %v4274_v1 }
 0x6ab   :  { %6139 = vmatmul.mubr.f32.gmra.mrb[14].mxu0 %v3630_v57  ;;  %v9052_v3 = vpack.c.bf16 %v4275_v15, %v4268_v5 }
 0x6ac   :  { %6896 = vmatpush3.bf16.msra.mxu0 %v9048_v30 }
 0x6ad   :  { %6898 = vmatprep.subr.bf16.mxu0 %v9052_v3 }
 0x772   :  { %v6129_v48 = vpop.f32.mrb[8].mxu0 }
 0x773   :  { %v3483_v24 = vpop.f32.mrb[9].mxu0  ;;  %v4116_v8 = vmul.f32 %v6129_v48, %v4114_v34 }
 0x774   :  { %v4115_v41 = vmul.f32 %v4114_v34, %v3483_v24 }
 0x775   :  { %v4122_v49 = vadd.f32 %v4120_v25, %v4116_v8 }
 0x776   :  { %v6132_v13 = vpop.f32.mrb[10].mxu0  ;;  %v4121_v35 = vadd.f32 %v4120_v25, %v4115_v41 }
 0x777   :  { %v3495_v36 = vpop.f32.mrb[11].mxu0  ;;  %v4118_v23 = vmul.f32 %v6132_v13, %v4114_v34 }
 0x778   :  { %v4117_v61 = vmul.f32 %v4114_v34, %v3495_v36 }
 0x779   :  { %v4124_v51 = vadd.f32 %v4120_v25, %v4118_v23 }
 0x77a   :  { %v6137_v40 = vpop.f32.mrb[12].mxu0  ;;  %v4123_v4 = vadd.f32 %v4120_v25, %v4117_v61 }
 0x77b   :  { %v3613_v37 = vadd.f32 %v6137_v40, %v3508_v9  ;;  %v3602_v44 = vpop.f32.mrb[13].mxu0 }
 0x77c   :  { %v3603_v62 = vadd.f32 %v3602_v44, %v3508_v9 }
 0x77d   :  { %v6946_v42 = vadd.f32 %v8927_v6, %v3613_v37 }
 0x77e   :  { %v6948_v26 = vadd.f32 %v8930_v56, %v3603_v62  ;;  %v6140_v17 = vpop.f32.mrb[14].mxu0 }
 0x77f   :  { %v4127_v0 = vmul.f32 %v6946_v42, %v4125_v33  ;;  %v3633_v53 = vadd.f32 %v6140_v17, %v3508_v9  ;;  %v3622_v27 = vpop.f32.mrb[15].mxu0 }
 0x780   :  { %v4126_v2 = vmul.f32 %v6948_v26, %v4125_v33  ;;  %v3623_v12 = vadd.f32 %v3622_v27, %v3508_v9 }
 0x781   :  { %v4131_v57 = vadd.f32 1.0, %v4127_v0  ;;  %v6950_v11 = vadd.f32 %v8933_v31, %v3633_v53 }
 0x782   :  { %v4130_v32 = vadd.f32 1.0, %v4126_v2  ;;  %v6952_v6 = vadd.f32 %v8936_v54, %v3623_v12 }
 0x783   :  { %v4135_v46 = vmul.f32 %v4131_v57, %v4122_v49  ;;  %v4129_v47 = vmul.f32 %v6950_v11, %v4125_v33 }
 0x784   :  { %v4134_v63 = vmul.f32 %v4130_v32, %v4121_v35  ;;  %v4128_v56 = vmul.f32 %v6952_v6, %v4125_v33 }
 0x785   :  { %v4146_v7 = vsel %vm9428_vm13, %v4135_v46, 0  ;;  %v4133_v39 = vadd.f32 1.0, %v4129_v47 }
 0x786   :  { %v9077_v14 = vand.u32 4294901760, %v4146_v7  ;;  %v4143_v52 = vsel %vm9429_vm2, %v4134_v63, 0  ;;  %v4132_v1 = vadd.f32 1.0, %v4128_v56 }
 0x787   :  { %v4223_v31 = vand.u32 4294901760, %v4143_v52  ;;  %v4137_v58 = vmul.f32 %v4133_v39, %v4124_v51 }
 0x788   :  { %v4234_v55 = vsub.f32 %v4146_v7, %v9077_v14  ;;  %v4136_v5 = vmul.f32 %v4132_v1, %v4123_v4 }
 0x789   :  { %v4152_v54 = vsel %vm9430_vm9, %v4137_v58, 0  ;;  %v4224_v15 = vsub.f32 %v4143_v52, %v4223_v31 }
 0x78a   :  { %v4253_v60 = vand.u32 4294901760, %v4152_v54  ;;  %v4149_v29 = vsel %vm9431_vm12, %v4136_v5, 0  ;;  %v4235_v16 = vand.u32 4294901760, %v4234_v55 }
 0x78b   :  { %v4243_v22 = vand.u32 4294901760, %v4149_v29  ;;  %v4225_v20 = vand.u32 4294901760, %v4224_v15 }
 0x78c   :  { %v4236_v19 = vsub.f32 %v4234_v55, %v4235_v16  ;;  %v4254_v48 = vsub.f32 %v4152_v54, %v4253_v60 }
 0x78d   :  { %v4226_v24 = vsub.f32 %v4224_v15, %v4225_v20  ;;  %v4244_v38 = vsub.f32 %v4149_v29, %v4243_v22 }
 0x78e   :  { %v4255_v13 = vand.u32 4294901760, %v4254_v48  ;;  %v4237_v34 = vand.u32 4294901760, %v4236_v19 }
 0x78f   :  { %v4227_v36 = vand.u32 4294901760, %v4226_v24  ;;  %v4245_v9 = vand.u32 4294901760, %v4244_v38 }
 0x790   :  { %v4256_v40 = vsub.f32 %v4254_v48, %v4255_v13 }
 0x791   :  { %6189 = vmatprep.mubr.f32.mxu0 %v4227_v36  ;;  %v4246_v37 = vsub.f32 %v4244_v38, %v4245_v9 }
 0x792   :  { %6190 = vmatmul.mubr.f32.vlgmr.msra.gmra.mrb[16].mxu0 %v4237_v34  ;;  %v4257_v33 = vand.u32 4294901760, %v4256_v40 }
 0x793   :  { %6900 = vmatpush3.bf16.msra.mxu0 %v9052_v3  ;;  %v4247_v44 = vand.u32 4294901760, %v4246_v37  ;;  %v4140_v3 = vsub.s32 0, %v9348_v21 }
 0x794   :  { %6902 = vmatprep.subr.bf16.mxu0 %v9055_v50 }
 0x795   :  { %6192 = vmatprep.mubr.f32.mxu0 %v4247_v44 }
 0x796   :  { %6193 = vmatmul.mubr.f32.gmra.mrb[18].mxu0 %v4257_v33 }
 0x797   :  { %6904 = vmatpush3.bf16.msra.mxu0 %v9055_v50  ;;  %6203 = vmatprep.mubr.f32.mxu0 %v4223_v31  ;;  %v4141_v50 = vrot.slane %v9069_v18, %v4140_v3 }
 0x798   :  { %6906 = vmatprep.subr.bf16.mxu0 %v9057_v59 }
 0x79a   :  { %6204 = vmatmul.mubr.f32.vlgmr.msra.gmra.mrb[16].mxu0 %v9077_v14 }
 0x79b   :  { %6206 = vmatprep.mubr.f32.mxu0 %v4243_v22  ;;  %6908 = vmatpush3.bf16.msra.mxu0 %v9057_v59 }
 0x79c   :  { %6910 = vmatprep.subr.bf16.mxu0 %v9059_v45 }
 0x79e   :  { %6207 = vmatmul.mubr.f32.gmra.mrb[18].mxu0 %v4253_v60 }
 0x79f   :  { %6912 = vmatpush3.bf16.msra.mxu0 %v9059_v45  ;;  %6217 = vmatprep.mubr.f32.mxu0 %v4224_v15 }
 0x7a0   :  { %6914 = vmatprep.subr.bf16.mxu0 %v9038_v28 }
 0x7a2   :  { %6218 = vmatmul.mubr.f32.vlgmr.msra.gmra.mrb[16].mxu0 %v4234_v55 }
 0x7a3   :  { %6220 = vmatprep.mubr.f32.mxu0 %v4244_v38  ;;  %6916 = vmatpush3.bf16.msra.mxu0 %v9038_v28 }
 0x7a4   :  { %6918 = vmatprep.subr.bf16.mxu0 %v9048_v30 }
 0x7a6   :  { %6221 = vmatmul.mubr.f32.gmra.mrb[18].mxu0 %v4254_v48 }
 0x7a7   :  { %6920 = vmatpush3.bf16.msra.mxu0 %v9048_v30  ;;  %6231 = vmatprep.mubr.f32.mxu0 %v4225_v20 }
 0x7a8   :  { %6922 = vmatprep.subr.bf16.mxu0 %v9061_v10 }
 0x7aa   :  { %6232 = vmatmul.mubr.f32.vlgmr.msra.gmra.mrb[16].mxu0 %v4235_v16 }
 0x7ab   :  { %6234 = vmatprep.mubr.f32.mxu0 %v4245_v9  ;;  %6924 = vmatpush3.bf16.msra.mxu0 %v9061_v10 }
 0x7ac   :  { %6926 = vmatprep.subr.bf16.mxu0 %v9063_v43 }
 0x7ae   :  { %6235 = vmatmul.mubr.f32.gmra.mrb[18].mxu0 %v4255_v13 }
 0x7af   :  { %6928 = vmatpush3.bf16.msra.mxu0 %v9063_v43  ;;  %6245 = vmatprep.mubr.f32.mxu0 %v4223_v31 }
 0x7b0   :  { %6930 = vmatprep.subr.bf16.mxu0 %v9038_v28 }
 0x7b2   :  { %6246 = vmatmul.mubr.f32.vlgmr.msra.gmra.mrb[16].mxu0 %v9077_v14 }
 0x7b3   :  { %6248 = vmatprep.mubr.f32.mxu0 %v4243_v22  ;;  %6932 = vmatpush3.bf16.msra.mxu0 %v9038_v28 }
 0x7b4   :  { %6934 = vmatprep.subr.bf16.mxu0 %v9048_v30 }
 0x7b6   :  { %6249 = vmatmul.mubr.f32.gmra.mrb[18].mxu0 %v4253_v60 }
 0x7b7   :  { %6936 = vmatpush3.bf16.msra.mxu0 %v9048_v30  ;;  %6259 = vmatprep.mubr.f32.mxu0 %v4223_v31 }
 0x7ba   :  { %6260 = vmatmul.mubr.f32.vlgmr.msra.gmra.mrb[16].mxu0 %v9077_v14 }
 0x7bb   :  { %6262 = vmatprep.mubr.f32.mxu0 %v4243_v22 }
 0x7be   :  { %6263 = vmatmul.mubr.f32.gmra.mrb[18].mxu0 %v4253_v60 }
 0x88d   :  { %v6261_v59 = vpop.f32.mrb[16].mxu0 }
 0x88e   :  { %v6953_v45 = vadd.f32 %v6261_v59, %v4141_v50  ;;  %v4746_v10 = vpop.f32.mrb[17].mxu0 }
 0x88f   :  { %v6954_v43 = vadd.f32 %v4746_v10, %v4141_v50 }
 0x890   :  { %4769 = vst.msk [vmem:[#allocation5 + $0x8] sm:$0xff] %vm9432_vm14, %v6953_v45 }
 0x891   :  { %4768 = vst.msk [vmem:[#allocation5] sm:$0xff] %vm9433_vm5, %v6954_v43  ;;  %v6264_v28 = vpop.f32.mrb[18].mxu0 }
 0x892   :  { %v6955_v30 = vadd.f32 %v6264_v28, %v4141_v50  ;;  %v4758_v62 = vpop.f32.mrb[19].mxu0 }
 0x893   :  { %v6956_v8 = vadd.f32 %v4758_v62, %v4141_v50 }
 0x894   :  { %4771 = vst.msk [vmem:[#allocation5 + $0x18] sm:$0xff] %vm9434_vm10, %v6955_v30 }
 0x895   :  { %4770 = vst.msk [vmem:[#allocation5 + $0x10] sm:$0xff] %vm9435_vm3, %v6956_v8 }
 0x896   :  { %7198 = shalt.err (!%p7195_p9)
}
 0x897   :  { %s7199_s21 = scalar_lea.hbm %s9127_s4, 512 }
 0x898   :  { %p7200_p10 = scmp.ne.s32.totalorder %s9127_s4, %s7199_s21  ;;  %p7203_p11 = scmp.lt.u32.totalorder %s7199_s21, %s9127_s4 }
 0x89a   :  { %p7205_p12 = pnand %p7203_p11, %p7200_p10 }
 0x89c   :  { %7208 = shalt.err (!%p7205_p12)
}
 0x89d   :  { %s7221_s5 = smov 128   ;;  %s7222_s26 = smov 8  }
 0x89e   :  { %4783 = dma.vmem_to_hbm [thread:$0]  %s4778_s17, 512, %s9127_s4, [#allocation3], %s7221_s5, %s7221_s5, %s7222_s26  }
 0x89f   :  { %7211 = dma.done.wait [#allocation3], 512  }
 0x8a0   :  { %7212 = vsyncadd [#allocation3], 4294966784 }
 0x8a1   :  { %4791 = vsyncpa [#allocation3], 1 }
 0x8a2   :  { %4792 = vsyncpa [#allocation4], 1 }

</bundles_post_ra>
